<compile_context>
chip_gen: v5e
topology: v5e:2x2
jax: 0.10.0
libtpu: 0.0.40
codegen_flags: <defaults>
</compile_context>

<pallas_src>
import functools

import jax
import jax.numpy as jnp
from jax.experimental import pallas as pl
from jax.experimental.pallas import tpu as pltpu

DIM_MNIST = 28 * 28  # 784
H1 = 512
H2 = 128
LANE = 128


def _round_up(x, m):
    return (x + m - 1) // m * m


def _enc_mnist_kernel(x_ref, w1_ref, b1_ref, w2_ref, b2_ref, wh_ref, bh_ref,
                      out_ref):
    cdt = w1_ref.dtype  # compute dtype for MXU operands (bf16 or f32)

    x = x_ref[...]                                                  # (bm, 784)

    # Linear(784 -> 512) + ReLU  (MXU in compute dtype, f32 accumulate/epilogue)
    h1 = jnp.dot(x, w1_ref[...], preferred_element_type=jnp.float32)
    h1 = jnp.maximum(h1 + b1_ref[...], 0.0).astype(cdt)             # (bm, 512)

    # Linear(512 -> 128) + ReLU
    h2 = jnp.dot(h1, w2_ref[...], preferred_element_type=jnp.float32)
    h2 = jnp.maximum(h2 + b2_ref[...], 0.0).astype(cdt)             # (bm, 128)

    # Fused mu/log_var head: one matmul, one lane-dense (bm, Lp) store.
    out = jnp.dot(h2, wh_ref[...], preferred_element_type=jnp.float32)
    out = out + bh_ref[...]
    out_ref[...] = out.astype(out_ref.dtype)


@functools.partial(jax.jit, static_argnames=("block_m", "compute_dtype"))
def enc_mnist_forward(x, params, *, block_m=256, compute_dtype=jnp.bfloat16):
    """x: (B, 784) float32. params: dict of PyTorch-convention (out,in) weights."""
    B = x.shape[0]
    L = params["wmu"].shape[0]
    Lp = _round_up(2 * L, LANE)        # fused head output padded to 128 lanes

    # --- parameter plumbing (outside the kernel, runs once under jit) ---
    w1 = params["w1"].T.astype(compute_dtype)          # (784, 512)
    w2 = params["w2"].T.astype(compute_dtype)          # (512, 128)
    b1 = params["b1"][None, :].astype(jnp.float32)     # (1, 512)
    b2 = params["b2"][None, :].astype(jnp.float32)     # (1, 128)

    # Fused head: [Wmu.T | Wvar.T] padded to Lp lanes; zero-padded lanes are
    # sliced off after the kernel.
    wh = jnp.concatenate([params["wmu"].T, params["wvar"].T], axis=1)  # (128, 2L)
    wh = jnp.pad(wh, ((0, 0), (0, Lp - 2 * L))).astype(compute_dtype)  # (128, Lp)
    bh = jnp.concatenate([params["bmu"], params["bvar"]])[None, :]     # (1, 2L)
    bh = jnp.pad(bh, ((0, 0), (0, Lp - 2 * L))).astype(jnp.float32)    # (1, Lp)

    # --- batch tiling: pad B instead of asserting divisibility ---
    bm = min(_round_up(block_m, 16), _round_up(B, 16))  # mult. of 16 (bf16 packing)
    B_pad = _round_up(B, bm)
    x_p = x.astype(compute_dtype)
    if B_pad != B:
        x_p = jnp.pad(x_p, ((0, B_pad - B), (0, 0)))

    grid = (B_pad // bm,)

    def full(shape):
        # Whole-array block, constant index_map -> stays VMEM-resident across
        # grid steps (Pallas skips re-DMA when the block index is unchanged).
        return pl.BlockSpec(shape, lambda i: (0,) * len(shape))

    out = pl.pallas_call(
        _enc_mnist_kernel,
        out_shape=jax.ShapeDtypeStruct((B_pad, Lp), jnp.float32),
        grid_spec=pltpu.PrefetchScalarGridSpec(
            num_scalar_prefetch=0,
            grid=grid,
            in_specs=[
                pl.BlockSpec((bm, DIM_MNIST), lambda i: (i, 0)),  # x tile
                full(w1.shape), full(b1.shape),
                full(w2.shape), full(b2.shape),
                full(wh.shape), full(bh.shape),
            ],
            out_specs=pl.BlockSpec((bm, Lp), lambda i: (i, 0)),
        ),
        compiler_params=pltpu.CompilerParams(
            dimension_semantics=("parallel",),
            vmem_limit_bytes=48 * 1024 * 1024),
    )(x_p, w1, b1, w2, b2, wh, bh)

    mu = out[:B, :L]
    log_var = out[:B, L:2 * L]
    return mu, log_var


def init_params(key, latent_dim):
    """Deterministic synthetic parameters with PyTorch Linear shapes (out, in)."""
    ks = jax.random.split(key, 8)

    def lin(kw, kb, out_f, in_f):
        scale = 1.0 / jnp.sqrt(in_f)
        w = jax.random.uniform(kw, (out_f, in_f), jnp.float32, -scale, scale)
        b = jax.random.uniform(kb, (out_f,), jnp.float32, -scale, scale)
        return w, b

    w1, b1 = lin(ks[0], ks[1], H1, DIM_MNIST)
    w2, b2 = lin(ks[2], ks[3], H2, H1)
    wmu, bmu = lin(ks[4], ks[5], latent_dim, H2)
    wvar, bvar = lin(ks[6], ks[7], latent_dim, H2)
    return dict(w1=w1, b1=b1, w2=w2, b2=b2,
                wmu=wmu, bmu=bmu, wvar=wvar, bvar=bvar)


def reference_forward(x, p):
    h1 = jnp.maximum(x @ p["w1"].T + p["b1"], 0.0)
    h2 = jnp.maximum(h1 @ p["w2"].T + p["b2"], 0.0)
    return h2 @ p["wmu"].T + p["bmu"], h2 @ p["wvar"].T + p["bvar"]


if __name__ == "__main__":
    key = jax.random.PRNGKey(0)
    k_x, k_p = jax.random.split(key)

    batch = 10          # deliberately NOT a multiple of the tile -> exercises padding
    latent_dim = 16
    x = jax.random.normal(k_x, (batch, DIM_MNIST), jnp.float32)
    params = init_params(k_p, latent_dim)

    mu_ref, lv_ref = reference_forward(x, params)

    # f32 compute path: tight tolerance against the f32 reference.
    mu32, lv32 = enc_mnist_forward(x, params, compute_dtype=jnp.float32)
    jax.block_until_ready((mu32, lv32))
    assert mu32.shape == (batch, latent_dim) and lv32.shape == (batch, latent_dim)
    assert jnp.allclose(mu32, mu_ref, atol=1e-4, rtol=1e-4)
    assert jnp.allclose(lv32, lv_ref, atol=1e-4, rtol=1e-4)

    # bf16 compute path (default, the fast MXU path): looser tolerance vs f32.
    mu, log_var = enc_mnist_forward(x, params)
    jax.block_until_ready((mu, log_var))
    assert mu.shape == (batch, latent_dim) and log_var.shape == (batch, latent_dim)
    assert jnp.allclose(mu, mu_ref, atol=3e-2, rtol=3e-2)
    assert jnp.allclose(log_var, lv_ref, atol=3e-2, rtol=3e-2)

    print("KERNEL_OK")
</pallas_src>

<mosaic_0001>
module attributes {stable_mosaic.version = 11 : i64} {
  func.func @_enc_mnist_kernel(%arg0: i32, %arg1: memref<16x784xf32, #tpu.memory_space<vmem>>, %arg2: memref<784x512xf32, #tpu.memory_space<vmem>>, %arg3: memref<1x512xf32, #tpu.memory_space<vmem>>, %arg4: memref<512x128xf32, #tpu.memory_space<vmem>>, %arg5: memref<1x128xf32, #tpu.memory_space<vmem>>, %arg6: memref<128x128xf32, #tpu.memory_space<vmem>>, %arg7: memref<1x128xf32, #tpu.memory_space<vmem>>, %arg8: memref<16x128xf32, #tpu.memory_space<vmem>>) attributes {dimension_semantics = [#tpu.dimension_semantics<parallel>], iteration_bounds = array<i64: 1>, scalar_prefetch = 0 : i64, scratch_operands = 0 : i64, tpu.core_type = #tpu.core_type<tc>, window_params = [{transform_indices = @transform_0, window_bounds = array<i64: 16, 784>}, {pipeline_mode = #tpu.pipeline_mode<synchronous>, transform_indices = @transform_1, window_bounds = array<i64: 784, 512>}, {pipeline_mode = #tpu.pipeline_mode<synchronous>, transform_indices = @transform_2, window_bounds = array<i64: 1, 512>}, {pipeline_mode = #tpu.pipeline_mode<synchronous>, transform_indices = @transform_3, window_bounds = array<i64: 512, 128>}, {pipeline_mode = #tpu.pipeline_mode<synchronous>, transform_indices = @transform_4, window_bounds = array<i64: 1, 128>}, {pipeline_mode = #tpu.pipeline_mode<synchronous>, transform_indices = @transform_5, window_bounds = array<i64: 128, 128>}, {pipeline_mode = #tpu.pipeline_mode<synchronous>, transform_indices = @transform_6, window_bounds = array<i64: 1, 128>}, {transform_indices = @transform_7, window_bounds = array<i64: 16, 128>}]} {
    %c0 = arith.constant 0 : index
    %c0_0 = arith.constant 0 : index
    %0 = vector.load %arg1[%c0, %c0_0] : memref<16x784xf32, #tpu.memory_space<vmem>>, vector<16x784xf32>
    %c0_1 = arith.constant 0 : index
    %c0_2 = arith.constant 0 : index
    %1 = vector.load %arg2[%c0_1, %c0_2] : memref<784x512xf32, #tpu.memory_space<vmem>>, vector<784x512xf32>
    %cst = arith.constant dense<0.000000e+00> : vector<16x512xf32>
    %2 = tpu.matmul %0, %1, %cst {dimension_numbers = #tpu.dot_dimension_numbers<[1], [0], [0], [1], [0, 0, 1, 1], [], []>} : vector<16x784xf32>, vector<784x512xf32>, vector<16x512xf32> -> vector<16x512xf32>
    %c0_3 = arith.constant 0 : index
    %c0_4 = arith.constant 0 : index
    %3 = vector.load %arg3[%c0_3, %c0_4] : memref<1x512xf32, #tpu.memory_space<vmem>>, vector<1x512xf32>
    %4 = vector.broadcast %3 : vector<1x512xf32> to vector<16x512xf32>
    %5 = arith.addf %2, %4 : vector<16x512xf32>
    %cst_5 = arith.constant 0.000000e+00 : f32
    %6 = vector.broadcast %cst_5 : f32 to vector<16x512xf32>
    %7 = arith.maximumf %5, %6 : vector<16x512xf32>
    %c0_6 = arith.constant 0 : index
    %c0_7 = arith.constant 0 : index
    %8 = vector.load %arg4[%c0_6, %c0_7] : memref<512x128xf32, #tpu.memory_space<vmem>>, vector<512x128xf32>
    %cst_8 = arith.constant dense<0.000000e+00> : vector<16x128xf32>
    %9 = tpu.matmul %7, %8, %cst_8 {dimension_numbers = #tpu.dot_dimension_numbers<[1], [0], [0], [1], [0, 0, 1, 1], [], []>} : vector<16x512xf32>, vector<512x128xf32>, vector<16x128xf32> -> vector<16x128xf32>
    %c0_9 = arith.constant 0 : index
    %c0_10 = arith.constant 0 : index
    %10 = vector.load %arg5[%c0_9, %c0_10] : memref<1x128xf32, #tpu.memory_space<vmem>>, vector<1x128xf32>
    %11 = vector.broadcast %10 : vector<1x128xf32> to vector<16x128xf32>
    %12 = arith.addf %9, %11 : vector<16x128xf32>
    %cst_11 = arith.constant 0.000000e+00 : f32
    %13 = vector.broadcast %cst_11 : f32 to vector<16x128xf32>
    %14 = arith.maximumf %12, %13 : vector<16x128xf32>
    %c0_12 = arith.constant 0 : index
    %c0_13 = arith.constant 0 : index
    %15 = vector.load %arg6[%c0_12, %c0_13] : memref<128x128xf32, #tpu.memory_space<vmem>>, vector<128x128xf32>
    %cst_14 = arith.constant dense<0.000000e+00> : vector<16x128xf32>
    %16 = tpu.matmul %14, %15, %cst_14 {dimension_numbers = #tpu.dot_dimension_numbers<[1], [0], [0], [1], [0, 0, 1, 1], [], []>} : vector<16x128xf32>, vector<128x128xf32>, vector<16x128xf32> -> vector<16x128xf32>
    %c0_15 = arith.constant 0 : index
    %c0_16 = arith.constant 0 : index
    %17 = vector.load %arg7[%c0_15, %c0_16] : memref<1x128xf32, #tpu.memory_space<vmem>>, vector<1x128xf32>
    %18 = vector.broadcast %17 : vector<1x128xf32> to vector<16x128xf32>
    %19 = arith.addf %16, %18 : vector<16x128xf32>
    %c0_17 = arith.constant 0 : index
    %c0_18 = arith.constant 0 : index
    %20 = vector.load %arg8[%c0_17, %c0_18] : memref<16x128xf32, #tpu.memory_space<vmem>>, vector<16x128xf32>
    tpu.vector_store %arg8[%c0_17, %c0_18], %19 {strides = array<i32>} : memref<16x128xf32, #tpu.memory_space<vmem>>, vector<16x128xf32>,
    return
  }
  func.func @transform_0(%arg0: i32) -> (i32, i32) {
    %c0_i32 = arith.constant 0 : i32
    %c0_i32_0 = arith.constant 0 : i32
    return %arg0, %c0_i32 : i32, i32
  }
  func.func @transform_1(%arg0: i32) -> (i32, i32) {
    %c0_i32 = arith.constant 0 : i32
    %c0_i32_0 = arith.constant 0 : i32
    %c0_i32_1 = arith.constant 0 : i32
    return %c0_i32, %c0_i32_0 : i32, i32
  }
  func.func @transform_2(%arg0: i32) -> (i32, i32) {
    %c0_i32 = arith.constant 0 : i32
    %c0_i32_0 = arith.constant 0 : i32
    %c0_i32_1 = arith.constant 0 : i32
    return %c0_i32, %c0_i32_0 : i32, i32
  }
  func.func @transform_3(%arg0: i32) -> (i32, i32) {
    %c0_i32 = arith.constant 0 : i32
    %c0_i32_0 = arith.constant 0 : i32
    %c0_i32_1 = arith.constant 0 : i32
    return %c0_i32, %c0_i32_0 : i32, i32
  }
  func.func @transform_4(%arg0: i32) -> (i32, i32) {
    %c0_i32 = arith.constant 0 : i32
    %c0_i32_0 = arith.constant 0 : i32
    %c0_i32_1 = arith.constant 0 : i32
    return %c0_i32, %c0_i32_0 : i32, i32
  }
  func.func @transform_5(%arg0: i32) -> (i32, i32) {
    %c0_i32 = arith.constant 0 : i32
    %c0_i32_0 = arith.constant 0 : i32
    %c0_i32_1 = arith.constant 0 : i32
    return %c0_i32, %c0_i32_0 : i32, i32
  }
  func.func @transform_6(%arg0: i32) -> (i32, i32) {
    %c0_i32 = arith.constant 0 : i32
    %c0_i32_0 = arith.constant 0 : i32
    %c0_i32_1 = arith.constant 0 : i32
    return %c0_i32, %c0_i32_0 : i32, i32
  }
  func.func @transform_7(%arg0: i32) -> (i32, i32) {
    %c0_i32 = arith.constant 0 : i32
    %c0_i32_0 = arith.constant 0 : i32
    return %arg0, %c0_i32 : i32, i32
  }
}

</mosaic_0001>

<bundles_post_ra>
// kernel: enc_mnist_forward.1
= control target key start
LH: loop header
LB: loop body
LE: loop exit
PB: predicated region body
PF: predicated region fallthrough
CT: control target
= control target key end

     0   :  { %12 = vsyncpa [#allocation3], 0  ;;  %s1969_s0 = inlined_call_operand.vmem [shape: f32[16,784], index: 0, kind: input, shape index: {}]   ;;  %s1970_s1 = inlined_call_operand.hbm [shape: f32[784,512], index: 1, kind: input, shape index: {}]   ;;  %s1971_s2 = inlined_call_operand.hbm [shape: f32[1,512], index: 2, kind: input, shape index: {}]   ;;  %s1972_s3 = inlined_call_operand.vmem [shape: f32[512,128], index: 3, kind: input, shape index: {}]   ;;  %s1973_s4 = inlined_call_operand.hbm [shape: f32[1,128], index: 4, kind: input, shape index: {}]   ;;  %s1974_s5 = inlined_call_operand.vmem [shape: f32[128,128], index: 5, kind: input, shape index: {}]   ;;  %s1975_s6 = inlined_call_operand.vmem [shape: f32[1,128], index: 6, kind: input, shape index: {}]   ;;  %s1976_s7 = inlined_call_operand.vmem [shape: f32[16,128], index: 7, kind: output, shape index: {}]  }
   0x1   :  { %13 = vsyncpa [#allocation5], 0  ;;  %s34_s26 = sshll.u32 %s1971_s2, 4  ;;  %s1462_s27 = smov [#allocation4]   ;;  %s35_s26 = int_to_ptr.hbm [resolvable:$true] %s34_s26 }
   0x2   :  { %s36_s28 = sshll.u32 %s1462_s27, 4  ;;  %s20_s8 = sshll.u32 %s1970_s1, 4  ;;  %s37_s28 = int_to_ptr.vmem [resolvable:$true] %s36_s28  ;;  %s21_s8 = int_to_ptr.hbm [resolvable:$true] %s20_s8 }
   0x3   :  { %39 = dma.hbm_to_vmem [thread:$0]  %s35_s26, 64, %s37_s28, [#allocation5]  }
   0x4   :  { %s1463_s9 = smov [#allocation2]   ;;  %s1464_s11 = smov 512  }
   0x5   :  { %s22_s10 = sshll.u32 %s1463_s9, 4  ;;  %s1465_s12 = smov 32   ;;  %s23_s10 = int_to_ptr.vmem [resolvable:$true] %s22_s10 }
   0x6   :  { %28 = dma.hbm_to_vmem [thread:$0]  %s21_s8, 50176, %s23_s10, [#allocation3], %s1464_s11, %s1464_s11, %s1465_s12  }
   0x7   :  { %s47_s2 = sshll.u32 %s1973_s4, 4  ;;  %s1466_s15 = smov [#allocation6]   ;;  %s48_s2 = int_to_ptr.hbm [resolvable:$true] %s47_s2 }
   0x8   :  { %s49_s16 = sshll.u32 %s1466_s15, 4  ;;  %s50_s16 = int_to_ptr.vmem [resolvable:$true] %s49_s16 }
   0x9   :  { %52 = dma.hbm_to_vmem [thread:$0]  %s48_s2, 16, %s50_s16, [#allocation5]  }
   0xa   :  { %1458 = dma.done.wait [#allocation3], 50176  }
   0xb   :  { %1459 = vsyncadd [#allocation3], 4294917120 }
   0xc   :  { %1460 = dma.done.wait [#allocation5], 80  }
   0xd   :  { %1461 = vsyncadd [#allocation5], 4294967216  ;;  %v143_v0 = vld [vmem:[#allocation2 + $0x1e0] sm:$0xff]  ;;  %vm485_vm0 = vcmask 130048  }
   0xe   :  { %v207_v1 = vld [vmem:[#allocation2 + $0x3e0] sm:$0xff]  ;;  %492 = vmatpush.msra.mxu0 %v143_v0 }
   0xf   :  { %v271_v2 = vld [vmem:[#allocation2 + $0x5e0] sm:$0xff]  ;;  %515 = vmatpush.msra.mxu1 %v207_v1 }
  0x10   :  { %v335_v3 = vld [vmem:[#allocation2 + $0x7e0] sm:$0xff]  ;;  %538 = vmatpush.msra.mxu2 %v271_v2 }
  0x11   :  { %v139_v4 = vld [vmem:[#allocation2 + $0x1c0] sm:$0xff]  ;;  %561 = vmatpush.msra.mxu3 %v335_v3  ;;  %v144_v3 = vld [vmem:[#allocation2 + $0x1e8] sm:$0xff] }
  0x12   :  { %v203_v5 = vld [vmem:[#allocation2 + $0x3c0] sm:$0xff]  ;;  %493 = vmatpush.msra.mxu0 %v139_v4 }
  0x13   :  { %v267_v6 = vld [vmem:[#allocation2 + $0x5c0] sm:$0xff]  ;;  %516 = vmatpush.msra.mxu1 %v203_v5 }
  0x14   :  { %v331_v7 = vld [vmem:[#allocation2 + $0x7c0] sm:$0xff]  ;;  %539 = vmatpush.msra.mxu2 %v267_v6 }
  0x15   :  { %v135_v8 = vld [vmem:[#allocation2 + $0x1a0] sm:$0xff]  ;;  %562 = vmatpush.msra.mxu3 %v331_v7  ;;  %v140_v7 = vld [vmem:[#allocation2 + $0x1c8] sm:$0xff] }
  0x16   :  { %v199_v9 = vld [vmem:[#allocation2 + $0x3a0] sm:$0xff]  ;;  %494 = vmatpush.msra.mxu0 %v135_v8  ;;  %v1519_v8 = vld [vmem:[%s1969_s0 + $0x10] sm:$0xff] }
  0x17   :  { %v263_v10 = vld [vmem:[#allocation2 + $0x5a0] sm:$0xff]  ;;  %517 = vmatpush.msra.mxu1 %v199_v9 }
  0x18   :  { %v327_v11 = vld [vmem:[#allocation2 + $0x7a0] sm:$0xff]  ;;  %540 = vmatpush.msra.mxu2 %v263_v10  ;;  %v208_v10 = vld [vmem:[#allocation2 + $0x3e8] sm:$0xff] }
  0x19   :  { %v131_v12 = vld [vmem:[#allocation2 + $0x180] sm:$0xff]  ;;  %563 = vmatpush.msra.mxu3 %v327_v11 }
  0x1a   :  { %v195_v13 = vld [vmem:[#allocation2 + $0x380] sm:$0xff]  ;;  %495 = vmatpush.msra.mxu0 %v131_v12  ;;  %v136_v12 = vld [vmem:[#allocation2 + $0x1a8] sm:$0xff] }
  0x1b   :  { %v259_v14 = vld [vmem:[#allocation2 + $0x580] sm:$0xff]  ;;  %518 = vmatpush.msra.mxu1 %v195_v13 }
  0x1c   :  { %v323_v15 = vld [vmem:[#allocation2 + $0x780] sm:$0xff]  ;;  %541 = vmatpush.msra.mxu2 %v259_v14  ;;  %v204_v14 = vld [vmem:[#allocation2 + $0x3c8] sm:$0xff] }
  0x1d   :  { %v127_v16 = vld [vmem:[#allocation2 + $0x160] sm:$0xff]  ;;  %564 = vmatpush.msra.mxu3 %v323_v15 }
  0x1e   :  { %v191_v17 = vld [vmem:[#allocation2 + $0x360] sm:$0xff]  ;;  %496 = vmatpush.msra.mxu0 %v127_v16  ;;  %v132_v16 = vld [vmem:[#allocation2 + $0x188] sm:$0xff] }
  0x1f   :  { %v255_v18 = vld [vmem:[#allocation2 + $0x560] sm:$0xff]  ;;  %519 = vmatpush.msra.mxu1 %v191_v17 }
  0x20   :  { %v319_v19 = vld [vmem:[#allocation2 + $0x760] sm:$0xff]  ;;  %542 = vmatpush.msra.mxu2 %v255_v18  ;;  %v200_v18 = vld [vmem:[#allocation2 + $0x3a8] sm:$0xff] }
  0x21   :  { %v123_v20 = vld [vmem:[#allocation2 + $0x140] sm:$0xff]  ;;  %565 = vmatpush.msra.mxu3 %v319_v19  ;;  %v1530_v19 = vld [vmem:[%s1969_s0 + $0x18] sm:$0xff] }
  0x22   :  { %v187_v21 = vld [vmem:[#allocation2 + $0x340] sm:$0xff]  ;;  %497 = vmatpush.msra.mxu0 %v123_v20 }
  0x23   :  { %v251_v22 = vld [vmem:[#allocation2 + $0x540] sm:$0xff]  ;;  %520 = vmatpush.msra.mxu1 %v187_v21 }
  0x24   :  { %v315_v23 = vld [vmem:[#allocation2 + $0x740] sm:$0xff]  ;;  %543 = vmatpush.msra.mxu2 %v251_v22  ;;  %v128_v22 = vld [vmem:[#allocation2 + $0x168] sm:$0xff] }
  0x25   :  { %v119_v24 = vld [vmem:[#allocation2 + $0x120] sm:$0xff]  ;;  %566 = vmatpush.msra.mxu3 %v315_v23  ;;  %v196_v23 = vld [vmem:[#allocation2 + $0x388] sm:$0xff] }
  0x26   :  { %v183_v25 = vld [vmem:[#allocation2 + $0x320] sm:$0xff]  ;;  %498 = vmatpush.msra.mxu0 %v119_v24  ;;  %v1537_v24 = vld [vmem:[%s1969_s0 + $0x8] sm:$0xff] }
  0x27   :  { %v247_v26 = vld [vmem:[#allocation2 + $0x520] sm:$0xff]  ;;  %521 = vmatpush.msra.mxu1 %v183_v25 }
  0x28   :  { %v311_v27 = vld [vmem:[#allocation2 + $0x720] sm:$0xff]  ;;  %544 = vmatpush.msra.mxu2 %v247_v26 }
  0x29   :  { %v115_v28 = vld [vmem:[#allocation2 + $0x100] sm:$0xff]  ;;  %567 = vmatpush.msra.mxu3 %v311_v27  ;;  %v124_v27 = vld [vmem:[#allocation2 + $0x148] sm:$0xff] }
  0x2a   :  { %v179_v29 = vld [vmem:[#allocation2 + $0x300] sm:$0xff]  ;;  %499 = vmatpush.msra.mxu0 %v115_v28  ;;  %v192_v28 = vld [vmem:[#allocation2 + $0x368] sm:$0xff] }
  0x2b   :  { %v243_v30 = vld [vmem:[#allocation2 + $0x500] sm:$0xff]  ;;  %522 = vmatpush.msra.mxu1 %v179_v29 }
  0x2c   :  { %v307_v31 = vld [vmem:[#allocation2 + $0x700] sm:$0xff]  ;;  %545 = vmatpush.msra.mxu2 %v243_v30 }
  0x2d   :  { %v111_v32 = vld [vmem:[#allocation2 + $0xe0] sm:$0xff]  ;;  %568 = vmatpush.msra.mxu3 %v307_v31  ;;  %v120_v31 = vld [vmem:[#allocation2 + $0x128] sm:$0xff] }
  0x2e   :  { %v175_v33 = vld [vmem:[#allocation2 + $0x2e0] sm:$0xff]  ;;  %500 = vmatpush.msra.mxu0 %v111_v32  ;;  %v188_v32 = vld [vmem:[#allocation2 + $0x348] sm:$0xff] }
  0x2f   :  { %v239_v34 = vld [vmem:[#allocation2 + $0x4e0] sm:$0xff]  ;;  %523 = vmatpush.msra.mxu1 %v175_v33 }
  0x30   :  { %v303_v35 = vld [vmem:[#allocation2 + $0x6e0] sm:$0xff]  ;;  %546 = vmatpush.msra.mxu2 %v239_v34 }
  0x31   :  { %v107_v36 = vld [vmem:[#allocation2 + $0xc0] sm:$0xff]  ;;  %569 = vmatpush.msra.mxu3 %v303_v35  ;;  %v116_v35 = vld [vmem:[#allocation2 + $0x108] sm:$0xff] }
  0x32   :  { %v171_v37 = vld [vmem:[#allocation2 + $0x2c0] sm:$0xff]  ;;  %501 = vmatpush.msra.mxu0 %v107_v36  ;;  %v184_v36 = vld [vmem:[#allocation2 + $0x328] sm:$0xff] }
  0x33   :  { %v235_v38 = vld [vmem:[#allocation2 + $0x4c0] sm:$0xff]  ;;  %524 = vmatpush.msra.mxu1 %v171_v37 }
  0x34   :  { %v299_v39 = vld [vmem:[#allocation2 + $0x6c0] sm:$0xff]  ;;  %547 = vmatpush.msra.mxu2 %v235_v38 }
  0x35   :  { %v103_v40 = vld [vmem:[#allocation2 + $0xa0] sm:$0xff]  ;;  %570 = vmatpush.msra.mxu3 %v299_v39  ;;  %v112_v39 = vld [vmem:[#allocation2 + $0xe8] sm:$0xff] }
  0x36   :  { %v167_v41 = vld [vmem:[#allocation2 + $0x2a0] sm:$0xff]  ;;  %502 = vmatpush.msra.mxu0 %v103_v40  ;;  %v180_v40 = vld [vmem:[#allocation2 + $0x308] sm:$0xff] }
  0x37   :  { %v231_v42 = vld [vmem:[#allocation2 + $0x4a0] sm:$0xff]  ;;  %525 = vmatpush.msra.mxu1 %v167_v41 }
  0x38   :  { %v295_v43 = vld [vmem:[#allocation2 + $0x6a0] sm:$0xff]  ;;  %548 = vmatpush.msra.mxu2 %v231_v42 }
  0x39   :  { %v99_v44 = vld [vmem:[#allocation2 + $0x80] sm:$0xff]  ;;  %571 = vmatpush.msra.mxu3 %v295_v43  ;;  %v108_v43 = vld [vmem:[#allocation2 + $0xc8] sm:$0xff] }
  0x3a   :  { %v163_v45 = vld [vmem:[#allocation2 + $0x280] sm:$0xff]  ;;  %503 = vmatpush.msra.mxu0 %v99_v44  ;;  %v176_v44 = vld [vmem:[#allocation2 + $0x2e8] sm:$0xff] }
  0x3b   :  { %v227_v46 = vld [vmem:[#allocation2 + $0x480] sm:$0xff]  ;;  %526 = vmatpush.msra.mxu1 %v163_v45 }
  0x3c   :  { %v291_v47 = vld [vmem:[#allocation2 + $0x680] sm:$0xff]  ;;  %549 = vmatpush.msra.mxu2 %v227_v46 }
  0x3d   :  { %v95_v48 = vld [vmem:[#allocation2 + $0x60] sm:$0xff]  ;;  %572 = vmatpush.msra.mxu3 %v291_v47  ;;  %v104_v47 = vld [vmem:[#allocation2 + $0xa8] sm:$0xff] }
  0x3e   :  { %v159_v49 = vld [vmem:[#allocation2 + $0x260] sm:$0xff]  ;;  %504 = vmatpush.msra.mxu0 %v95_v48  ;;  %v1543_v48 = vld [vmem:[%s1969_s0 + $0x48] sm:$0xff] }
  0x3f   :  { %v223_v50 = vld [vmem:[#allocation2 + $0x460] sm:$0xff]  ;;  %527 = vmatpush.msra.mxu1 %v159_v49 }
  0x40   :  { %v287_v51 = vld [vmem:[#allocation2 + $0x660] sm:$0xff]  ;;  %550 = vmatpush.msra.mxu2 %v223_v50  ;;  %v172_v50 = vld [vmem:[#allocation2 + $0x2c8] sm:$0xff] }
  0x41   :  { %v91_v52 = vld [vmem:[#allocation2 + $0x40] sm:$0xff]  ;;  %573 = vmatpush.msra.mxu3 %v287_v51 }
  0x42   :  { %v155_v53 = vld [vmem:[#allocation2 + $0x240] sm:$0xff]  ;;  %505 = vmatpush.msra.mxu0 %v91_v52  ;;  %v100_v52 = vld [vmem:[#allocation2 + $0x88] sm:$0xff] }
  0x43   :  { %v219_v54 = vld [vmem:[#allocation2 + $0x440] sm:$0xff]  ;;  %528 = vmatpush.msra.mxu1 %v155_v53  ;;  %v1548_v53 = vld [vmem:[%s1969_s0 + $0x38] sm:$0xff] }
  0x44   :  { %v283_v55 = vld [vmem:[#allocation2 + $0x640] sm:$0xff]  ;;  %551 = vmatpush.msra.mxu2 %v219_v54  ;;  %v168_v54 = vld [vmem:[#allocation2 + $0x2a8] sm:$0xff] }
  0x45   :  { %v87_v56 = vld [vmem:[#allocation2 + $0x20] sm:$0xff]  ;;  %574 = vmatpush.msra.mxu3 %v283_v55 }
  0x46   :  { %v151_v57 = vld [vmem:[#allocation2 + $0x220] sm:$0xff]  ;;  %506 = vmatpush.msra.mxu0 %v87_v56 }
  0x47   :  { %v215_v58 = vld [vmem:[#allocation2 + $0x420] sm:$0xff]  ;;  %529 = vmatpush.msra.mxu1 %v151_v57  ;;  %v96_v57 = vld [vmem:[#allocation2 + $0x68] sm:$0xff] }
  0x48   :  { %v279_v59 = vld [vmem:[#allocation2 + $0x620] sm:$0xff]  ;;  %552 = vmatpush.msra.mxu2 %v215_v58 }
  0x49   :  { %v83_v60 = vld [vmem:[#allocation2] sm:$0xff]  ;;  %575 = vmatpush.msra.mxu3 %v279_v59  ;;  %v164_v59 = vld [vmem:[#allocation2 + $0x288] sm:$0xff] }
  0x4a   :  { %v147_v61 = vld [vmem:[#allocation2 + $0x200] sm:$0xff]  ;;  %507 = vmatpush.msra.mxu0 %v83_v60 }
  0x4b   :  { %v211_v62 = vld [vmem:[#allocation2 + $0x400] sm:$0xff]  ;;  %530 = vmatpush.msra.mxu1 %v147_v61 }
  0x4c   :  { %v275_v63 = vld [vmem:[#allocation2 + $0x600] sm:$0xff]  ;;  %553 = vmatpush.msra.mxu2 %v211_v62  ;;  %531 = vmatmul.f32.vlgmr.msra.gmra.mxu1 %v1537_v24  ;;  %v92_v62 = vld [vmem:[#allocation2 + $0x48] sm:$0xff] }
  0x4d   :  { %v399_v0 = vld [vmem:[#allocation2 + $0x9e0] sm:$0xff]  ;;  %576 = vmatpush.msra.mxu3 %v275_v63  ;;  %554 = vmatmul.f32.vlgmr.msra.gmra.mxu2 %v1519_v8  ;;  %v160_v63 = vld [vmem:[#allocation2 + $0x268] sm:$0xff] }
  0x4e   :  { %v463_v1 = vld [vmem:[#allocation2 + $0xbe0] sm:$0xff]  ;;  %584 = vmatpush.msrb.mxu0 %v399_v0  ;;  %577 = vmatmul.f32.vlgmr.msra.gmra.mxu3 %v1530_v19 }
  0x4f   :  { %v471_v2 = vld [vmem:[#allocation2 + $0xc20] sm:$0xff]  ;;  %607 = vmatpush.msrb.mxu1 %v463_v1  ;;  %653 = vmatpush.msrb.mxu3 %v144_v3  ;;  %v1561_v3 = vld [vmem:[%s1969_s0 + $0x30] sm:$0xff] }
  0x50   :  { %v395_v4 = vld [vmem:[#allocation2 + $0x9c0] sm:$0xff]  ;;  %644 = vmatpush.msrb.mxu2 %v471_v2  ;;  %v88_v2 = vld [vmem:[#allocation2 + $0x28] sm:$0xff] }
  0x51   :  { %v459_v5 = vld [vmem:[#allocation2 + $0xbc0] sm:$0xff]  ;;  %585 = vmatpush.msrb.mxu0 %v395_v4  ;;  %654 = vmatpush.msrb.mxu3 %v140_v7  ;;  %v156_v4 = vld [vmem:[#allocation2 + $0x248] sm:$0xff] }
  0x52   :  { %v467_v6 = vld [vmem:[#allocation2 + $0xc00] sm:$0xff]  ;;  %608 = vmatpush.msrb.mxu1 %v459_v5  ;;  %v84_v7 = vld [vmem:[#allocation2 + $0x8] sm:$0xff] }
  0x53   :  { %v391_v9 = vld [vmem:[#allocation2 + $0x9a0] sm:$0xff]  ;;  %645 = vmatpush.msrb.mxu2 %v467_v6  ;;  %655 = vmatpush.msrb.mxu3 %v136_v12  ;;  %v272_v12 = vld [vmem:[#allocation2 + $0x5e8] sm:$0xff] }
  0x54   :  { %v455_v11 = vld [vmem:[#allocation2 + $0xba0] sm:$0xff]  ;;  %586 = vmatpush.msrb.mxu0 %v391_v9  ;;  %v1568_v9 = vld [vmem:[%s1969_s0 + $0x50] sm:$0xff] }
  0x55   :  { %v387_v13 = vld [vmem:[#allocation2 + $0x980] sm:$0xff]  ;;  %676 = vmatpush.msra.mxu2 %v208_v10  ;;  %609 = vmatpush.msrb.mxu1 %v455_v11  ;;  %v152_v11 = vld [vmem:[#allocation2 + $0x228] sm:$0xff] }
  0x56   :  { %v451_v15 = vld [vmem:[#allocation2 + $0xb80] sm:$0xff]  ;;  %587 = vmatpush.msrb.mxu0 %v387_v13  ;;  %656 = vmatpush.msrb.mxu3 %v132_v16  ;;  %v336_v13 = vld [vmem:[#allocation2 + $0x7e8] sm:$0xff] }
  0x57   :  { %v1525_v17 = vld [vmem:[%s1969_s0] sm:$0xff]  ;;  %677 = vmatpush.msra.mxu2 %v204_v14  ;;  %610 = vmatpush.msrb.mxu1 %v451_v15  ;;  %v400_v14 = vld [vmem:[#allocation2 + $0x9e8] sm:$0xff] }
  0x58   :  { %v383_v20 = vld [vmem:[#allocation2 + $0x960] sm:$0xff]  ;;  %508 = vmatmul.f32.vlgmr.msra.gmra.mxu0 %v1525_v17  ;;  %657 = vmatpush.msrb.mxu3 %v128_v22  ;;  %v1580_v15 = vld [vmem:[%s1969_s0 + $0x28] sm:$0xff] }
  0x59   :  { %v447_v21 = vld [vmem:[#allocation2 + $0xb60] sm:$0xff]  ;;  %678 = vmatpush.msra.mxu2 %v200_v18  ;;  %588 = vmatpush.msrb.mxu0 %v383_v20  ;;  %v148_v16 = vld [vmem:[#allocation2 + $0x208] sm:$0xff] }
  0x5a   :  { %v379_v25 = vld [vmem:[#allocation2 + $0x940] sm:$0xff]  ;;  %611 = vmatpush.msrb.mxu1 %v447_v21  ;;  %658 = vmatpush.msrb.mxu3 %v124_v27  ;;  %v268_v18 = vld [vmem:[#allocation2 + $0x5c8] sm:$0xff] }
  0x5b   :  { %v443_v26 = vld [vmem:[#allocation2 + $0xb40] sm:$0xff]  ;;  %679 = vmatpush.msra.mxu2 %v196_v23  ;;  %589 = vmatpush.msrb.mxu0 %v379_v25  ;;  %v332_v20 = vld [vmem:[#allocation2 + $0x7c8] sm:$0xff] }
  0x5c   :  { %v375_v29 = vld [vmem:[#allocation2 + $0x920] sm:$0xff]  ;;  %612 = vmatpush.msrb.mxu1 %v443_v26  ;;  %659 = vmatpush.msrb.mxu3 %v120_v31  ;;  %v396_v21 = vld [vmem:[#allocation2 + $0x9c8] sm:$0xff] }
  0x5d   :  { %v439_v30 = vld [vmem:[#allocation2 + $0xb20] sm:$0xff]  ;;  %680 = vmatpush.msra.mxu2 %v192_v28  ;;  %590 = vmatpush.msrb.mxu0 %v375_v29  ;;  %v464_v22 = vld [vmem:[#allocation2 + $0xbe8] sm:$0xff] }
  0x5e   :  { %v371_v33 = vld [vmem:[#allocation2 + $0x900] sm:$0xff]  ;;  %613 = vmatpush.msrb.mxu1 %v439_v30  ;;  %660 = vmatpush.msrb.mxu3 %v116_v35  ;;  %v264_v23 = vld [vmem:[#allocation2 + $0x5a8] sm:$0xff] }
  0x5f   :  { %v435_v34 = vld [vmem:[#allocation2 + $0xb00] sm:$0xff]  ;;  %681 = vmatpush.msra.mxu2 %v188_v32  ;;  %591 = vmatpush.msrb.mxu0 %v371_v33  ;;  %v328_v25 = vld [vmem:[#allocation2 + $0x7a8] sm:$0xff]  ;;  %v1591_v33 = vld [vmem:[%s1969_s0 + $0x58] sm:$0xff] }
  0x60   :  { %v367_v37 = vld [vmem:[#allocation2 + $0x8e0] sm:$0xff]  ;;  %614 = vmatpush.msrb.mxu1 %v435_v34  ;;  %661 = vmatpush.msrb.mxu3 %v112_v39  ;;  %v392_v26 = vld [vmem:[#allocation2 + $0x9a8] sm:$0xff] }
  0x61   :  { %v431_v38 = vld [vmem:[#allocation2 + $0xae0] sm:$0xff]  ;;  %682 = vmatpush.msra.mxu2 %v184_v36  ;;  %592 = vmatpush.msrb.mxu0 %v367_v37  ;;  %v460_v27 = vld [vmem:[#allocation2 + $0xbc8] sm:$0xff] }
  0x62   :  { %v363_v41 = vld [vmem:[#allocation2 + $0x8c0] sm:$0xff]  ;;  %615 = vmatpush.msrb.mxu1 %v431_v38  ;;  %662 = vmatpush.msrb.mxu3 %v108_v43  ;;  %v1586_v28 = vld [vmem:[%s1969_s0 + $0x68] sm:$0xff] }
  0x63   :  { %v427_v42 = vld [vmem:[#allocation2 + $0xac0] sm:$0xff]  ;;  %683 = vmatpush.msra.mxu2 %v180_v40  ;;  %593 = vmatpush.msrb.mxu0 %v363_v41  ;;  %v260_v29 = vld [vmem:[#allocation2 + $0x588] sm:$0xff] }
  0x64   :  { %v359_v45 = vld [vmem:[#allocation2 + $0x8a0] sm:$0xff]  ;;  %616 = vmatpush.msrb.mxu1 %v427_v42  ;;  %663 = vmatpush.msrb.mxu3 %v104_v47  ;;  %v324_v30 = vld [vmem:[#allocation2 + $0x788] sm:$0xff] }
  0x65   :  { %v423_v46 = vld [vmem:[#allocation2 + $0xaa0] sm:$0xff]  ;;  %684 = vmatpush.msra.mxu2 %v176_v44  ;;  %594 = vmatpush.msrb.mxu0 %v359_v45  ;;  %v388_v31 = vld [vmem:[#allocation2 + $0x988] sm:$0xff] }
  0x66   :  { %v355_v49 = vld [vmem:[#allocation2 + $0x880] sm:$0xff]  ;;  %617 = vmatpush.msrb.mxu1 %v423_v46  ;;  %557 = vmatmul.f32.gmra.mxu2 %v1543_v48  ;;  %v456_v32 = vld [vmem:[#allocation2 + $0xba8] sm:$0xff] }
  0x67   :  { %v419_v51 = vld [vmem:[#allocation2 + $0xa80] sm:$0xff]  ;;  %595 = vmatpush.msrb.mxu0 %v355_v49  ;;  %685 = vmatpush.msra.mxu2 %v172_v50  ;;  %v256_v34 = vld [vmem:[#allocation2 + $0x568] sm:$0xff] }
  0x68   :  { %v351_v55 = vld [vmem:[#allocation2 + $0x860] sm:$0xff]  ;;  %618 = vmatpush.msrb.mxu1 %v419_v51  ;;  %664 = vmatpush.msrb.mxu3 %v100_v52  ;;  %v320_v35 = vld [vmem:[#allocation2 + $0x768] sm:$0xff] }
  0x69   :  { %v415_v56 = vld [vmem:[#allocation2 + $0xa60] sm:$0xff]  ;;  %511 = vmatmul.f32.gmra.mxu0 %v1548_v53  ;;  %686 = vmatpush.msra.mxu2 %v168_v54  ;;  %v384_v36 = vld [vmem:[#allocation2 + $0x968] sm:$0xff] }
  0x6a   :  { %v1555_v58 = vld [vmem:[%s1969_s0 + $0x40] sm:$0xff]  ;;  %596 = vmatpush.msrb.mxu0 %v351_v55  ;;  %619 = vmatpush.msrb.mxu1 %v415_v56  ;;  %v452_v37 = vld [vmem:[#allocation2 + $0xb88] sm:$0xff] }
  0x6b   :  { %v347_v60 = vld [vmem:[#allocation2 + $0x840] sm:$0xff]  ;;  %665 = vmatpush.msrb.mxu3 %v96_v57  ;;  %534 = vmatmul.f32.gmra.mxu1 %v1555_v58  ;;  %v252_v39 = vld [vmem:[#allocation2 + $0x548] sm:$0xff] }
  0x6c   :  { %v411_v61 = vld [vmem:[#allocation2 + $0xa40] sm:$0xff]  ;;  %687 = vmatpush.msra.mxu2 %v164_v59  ;;  %597 = vmatpush.msrb.mxu0 %v347_v60  ;;  %v316_v40 = vld [vmem:[#allocation2 + $0x748] sm:$0xff] }
  0x6d   :  { %v343_v0 = vld [vmem:[#allocation2 + $0x820] sm:$0xff]  ;;  %620 = vmatpush.msrb.mxu1 %v411_v61  ;;  %666 = vmatpush.msrb.mxu3 %v92_v62  ;;  %v380_v41 = vld [vmem:[#allocation2 + $0x948] sm:$0xff] }
  0x6e   :  { %v407_v1 = vld [vmem:[#allocation2 + $0xa20] sm:$0xff]  ;;  %688 = vmatpush.msra.mxu2 %v160_v63  ;;  %598 = vmatpush.msrb.mxu0 %v343_v0  ;;  %v448_v42 = vld [vmem:[#allocation2 + $0xb68] sm:$0xff] }
  0x6f   :  { %v339_v5 = vld [vmem:[#allocation2 + $0x800] sm:$0xff]  ;;  %621 = vmatpush.msrb.mxu1 %v407_v1  ;;  %667 = vmatpush.msrb.mxu3 %v88_v2  ;;  %v248_v43 = vld [vmem:[#allocation2 + $0x528] sm:$0xff] }
  0x70   :  { %v403_v6 = vld [vmem:[#allocation2 + $0xa00] sm:$0xff]  ;;  %1357 = vmatmul.msk.f32.vlgmr.msrb.gmra.mxu2 %vm485_vm0, %v1561_v3  ;;  %599 = vmatpush.msrb.mxu0 %v339_v5  ;;  %v312_v44 = vld [vmem:[#allocation2 + $0x728] sm:$0xff] }
  0x71   :  { %v1573_v10 = vld [vmem:[%s1969_s0 + $0x20] sm:$0xff]  ;;  %689 = vmatpush.msra.mxu2 %v156_v4  ;;  %622 = vmatpush.msrb.mxu1 %v403_v6  ;;  %v376_v45 = vld [vmem:[#allocation2 + $0x928] sm:$0xff] }
  0x72   :  { %668 = vmatpush.msrb.mxu3 %v84_v7  ;;  %600 = vmatmul.f32.vlgmr.msrb.gmra.mxu0 %v1573_v10  ;;  %v1599_v38 = vld [vmem:[%s1969_s0 + $0x60] sm:$0xff]  ;;  %v444_v46 = vld [vmem:[#allocation2 + $0xb48] sm:$0xff] }
  0x73   :  { %580 = vmatmul.f32.gmra.mxu3 %v1568_v9  ;;  %690 = vmatpush.msra.mxu2 %v152_v11  ;;  %v244_v47 = vld [vmem:[#allocation2 + $0x508] sm:$0xff] }
  0x74   :  { %699 = vmatpush.msra.mxu0 %v272_v12  ;;  %722 = vmatpush.msra.mxu1 %v336_v13  ;;  %v308_v49 = vld [vmem:[#allocation2 + $0x708] sm:$0xff] }
  0x75   :  { %745 = vmatpush.msra.mxu3 %v400_v14  ;;  %623 = vmatmul.f32.vlgmr.msrb.gmra.mxu1 %v1580_v15  ;;  %v372_v50 = vld [vmem:[#allocation2 + $0x908] sm:$0xff] }
  0x76   :  { %691 = vmatpush.msra.mxu2 %v148_v16  ;;  %700 = vmatpush.msra.mxu0 %v268_v18  ;;  %v440_v51 = vld [vmem:[#allocation2 + $0xb28] sm:$0xff] }
  0x77   :  { %723 = vmatpush.msra.mxu1 %v332_v20  ;;  %746 = vmatpush.msra.mxu3 %v396_v21  ;;  %v240_v52 = vld [vmem:[#allocation2 + $0x4e8] sm:$0xff] }
  0x78   :  { %768 = vmatpush.msrb.mxu2 %v464_v22  ;;  %701 = vmatpush.msra.mxu0 %v264_v23  ;;  %v304_v54 = vld [vmem:[#allocation2 + $0x6e8] sm:$0xff] }
  0x79   :  { %724 = vmatpush.msra.mxu1 %v328_v25  ;;  %747 = vmatpush.msra.mxu3 %v392_v26  ;;  %v368_v55 = vld [vmem:[#allocation2 + $0x8e8] sm:$0xff] }
  0x7a   :  { %769 = vmatpush.msrb.mxu2 %v460_v27  ;;  %702 = vmatpush.msra.mxu0 %v260_v29  ;;  %v436_v56 = vld [vmem:[#allocation2 + $0xb08] sm:$0xff] }
  0x7b   :  { %1358 = vmatmul.msk.f32.gmra.mxu2 %vm485_vm0, %v1586_v28  ;;  %725 = vmatpush.msra.mxu1 %v324_v30  ;;  %v236_v57 = vld [vmem:[#allocation2 + $0x4c8] sm:$0xff] }
  0x7c   :  { %748 = vmatpush.msra.mxu3 %v388_v31  ;;  %770 = vmatpush.msrb.mxu2 %v456_v32  ;;  %v300_v59 = vld [vmem:[#allocation2 + $0x6c8] sm:$0xff]  ;;  %v145_v31 = vld [vmem:[#allocation2 + $0x1f0] sm:$0xff] }
  0x7d   :  { %603 = vmatmul.f32.gmra.mxu0 %v1591_v33  ;;  %726 = vmatpush.msra.mxu1 %v320_v35  ;;  %v364_v60 = vld [vmem:[#allocation2 + $0x8c8] sm:$0xff]  ;;  %v209_v32 = vld [vmem:[#allocation2 + $0x3f0] sm:$0xff] }
  0x7e   :  { %703 = vmatpush.msra.mxu0 %v256_v34  ;;  %749 = vmatpush.msra.mxu3 %v384_v36  ;;  %v432_v61 = vld [vmem:[#allocation2 + $0xae8] sm:$0xff]  ;;  %v141_v36 = vld [vmem:[#allocation2 + $0x1d0] sm:$0xff] }
  0x7f   :  { %771 = vmatpush.msrb.mxu2 %v452_v37  ;;  %626 = vmatmul.f32.gmra.mxu1 %v1599_v38  ;;  %v232_v62 = vld [vmem:[#allocation2 + $0x4a8] sm:$0xff]  ;;  %v205_v37 = vld [vmem:[#allocation2 + $0x3d0] sm:$0xff] }
  0x80   :  { %704 = vmatpush.msra.mxu0 %v252_v39  ;;  %727 = vmatpush.msra.mxu1 %v316_v40  ;;  %v296_v63 = vld [vmem:[#allocation2 + $0x6a8] sm:$0xff]  ;;  %v337_v39 = vld [vmem:[#allocation2 + $0x7f0] sm:$0xff] }
  0x81   :  { %750 = vmatpush.msra.mxu3 %v380_v41  ;;  %772 = vmatpush.msrb.mxu2 %v448_v42  ;;  %v360_v0 = vld [vmem:[#allocation2 + $0x8a8] sm:$0xff]  ;;  %v137_v41 = vld [vmem:[#allocation2 + $0x1b0] sm:$0xff] }
  0x82   :  { %705 = vmatpush.msra.mxu0 %v248_v43  ;;  %728 = vmatpush.msra.mxu1 %v312_v44  ;;  %v428_v1 = vld [vmem:[#allocation2 + $0xac8] sm:$0xff]  ;;  %v201_v42 = vld [vmem:[#allocation2 + $0x3b0] sm:$0xff] }
  0x83   :  { %751 = vmatpush.msra.mxu3 %v376_v45  ;;  %773 = vmatpush.msrb.mxu2 %v444_v46  ;;  %v228_v2 = vld [vmem:[#allocation2 + $0x488] sm:$0xff]  ;;  %v333_v43 = vld [vmem:[#allocation2 + $0x7d0] sm:$0xff] }
  0x84   :  { %706 = vmatpush.msra.mxu0 %v244_v47  ;;  %729 = vmatpush.msra.mxu1 %v308_v49  ;;  %v292_v4 = vld [vmem:[#allocation2 + $0x688] sm:$0xff]  ;;  %v133_v44 = vld [vmem:[#allocation2 + $0x190] sm:$0xff] }
  0x85   :  { %752 = vmatpush.msra.mxu3 %v372_v50  ;;  %774 = vmatpush.msrb.mxu2 %v440_v51  ;;  %v356_v5 = vld [vmem:[#allocation2 + $0x888] sm:$0xff]  ;;  %v197_v45 = vld [vmem:[#allocation2 + $0x390] sm:$0xff] }
  0x86   :  { %707 = vmatpush.msra.mxu0 %v240_v52  ;;  %730 = vmatpush.msra.mxu1 %v304_v54  ;;  %v424_v6 = vld [vmem:[#allocation2 + $0xaa8] sm:$0xff]  ;;  %v329_v46 = vld [vmem:[#allocation2 + $0x7b0] sm:$0xff] }
  0x87   :  { %753 = vmatpush.msra.mxu3 %v368_v55  ;;  %775 = vmatpush.msrb.mxu2 %v436_v56  ;;  %v224_v7 = vld [vmem:[#allocation2 + $0x468] sm:$0xff]  ;;  %v129_v47 = vld [vmem:[#allocation2 + $0x170] sm:$0xff] }
  0x88   :  { %708 = vmatpush.msra.mxu0 %v236_v57  ;;  %731 = vmatpush.msra.mxu1 %v300_v59  ;;  %v288_v11 = vld [vmem:[#allocation2 + $0x668] sm:$0xff]  ;;  %v193_v49 = vld [vmem:[#allocation2 + $0x370] sm:$0xff] }
  0x89   :  { %754 = vmatpush.msra.mxu3 %v364_v60  ;;  %776 = vmatpush.msrb.mxu2 %v432_v61  ;;  %v352_v12 = vld [vmem:[#allocation2 + $0x868] sm:$0xff]  ;;  %v273_v50 = vld [vmem:[#allocation2 + $0x5f0] sm:$0xff] }
  0x8a   :  { %709 = vmatpush.msra.mxu0 %v232_v62  ;;  %732 = vmatpush.msra.mxu1 %v296_v63  ;;  %v420_v13 = vld [vmem:[#allocation2 + $0xa88] sm:$0xff]  ;;  %v325_v51 = vld [vmem:[#allocation2 + $0x790] sm:$0xff] }
  0x8b   :  { %755 = vmatpush.msra.mxu3 %v360_v0  ;;  %777 = vmatpush.msrb.mxu2 %v428_v1  ;;  %v220_v14 = vld [vmem:[#allocation2 + $0x448] sm:$0xff]  ;;  %v125_v52 = vld [vmem:[#allocation2 + $0x150] sm:$0xff] }
  0x8c   :  { %669 = vmatmul.f32.vlgmr.msrb.gmra.mxu3 %v1525_v17  ;;  %710 = vmatpush.msra.mxu0 %v228_v2  ;;  %v284_v16 = vld [vmem:[#allocation2 + $0x648] sm:$0xff]  ;;  %v189_v54 = vld [vmem:[#allocation2 + $0x350] sm:$0xff] }
  0x8d   :  { %733 = vmatpush.msra.mxu1 %v292_v4  ;;  %756 = vmatpush.msra.mxu3 %v356_v5  ;;  %v348_v18 = vld [vmem:[#allocation2 + $0x848] sm:$0xff]  ;;  %v269_v55 = vld [vmem:[#allocation2 + $0x5d0] sm:$0xff] }
  0x8e   :  { %692 = vmatmul.f32.vlgmr.msra.gmra.mxu2 %v1537_v24  ;;  %711 = vmatpush.msra.mxu0 %v224_v7  ;;  %v416_v20 = vld [vmem:[#allocation2 + $0xa68] sm:$0xff]  ;;  %v321_v56 = vld [vmem:[#allocation2 + $0x770] sm:$0xff] }
  0x8f   :  { %778 = vmatpush.msrb.mxu2 %v424_v6  ;;  %734 = vmatpush.msra.mxu1 %v288_v11  ;;  %v216_v21 = vld [vmem:[#allocation2 + $0x428] sm:$0xff]  ;;  %v121_v57 = vld [vmem:[#allocation2 + $0x130] sm:$0xff] }
  0x90   :  { %757 = vmatpush.msra.mxu3 %v352_v12  ;;  %712 = vmatpush.msra.mxu0 %v220_v14  ;;  %v280_v22 = vld [vmem:[#allocation2 + $0x628] sm:$0xff]  ;;  %v185_v59 = vld [vmem:[#allocation2 + $0x330] sm:$0xff] }
  0x91   :  { %779 = vmatpush.msrb.mxu2 %v420_v13  ;;  %v344_v23 = vld [vmem:[#allocation2 + $0x828] sm:$0xff]  ;;  %735 = vmatpush.msra.mxu1 %v284_v16  ;;  %v265_v60 = vld [vmem:[#allocation2 + $0x5b0] sm:$0xff] }
  0x92   :  { %758 = vmatpush.msra.mxu3 %v348_v18  ;;  %v412_v25 = vld [vmem:[#allocation2 + $0xa48] sm:$0xff]  ;;  %713 = vmatpush.msra.mxu0 %v216_v21  ;;  %v317_v61 = vld [vmem:[#allocation2 + $0x750] sm:$0xff] }
  0x93   :  { %780 = vmatpush.msrb.mxu2 %v416_v20  ;;  %v212_v26 = vld [vmem:[#allocation2 + $0x408] sm:$0xff]  ;;  %736 = vmatpush.msra.mxu1 %v280_v22  ;;  %v117_v62 = vld [vmem:[#allocation2 + $0x110] sm:$0xff] }
  0x94   :  { %v276_v27 = vld [vmem:[#allocation2 + $0x608] sm:$0xff]  ;;  %759 = vmatpush.msra.mxu3 %v344_v23  ;;  %714 = vmatpush.msra.mxu0 %v212_v26  ;;  %v181_v63 = vld [vmem:[#allocation2 + $0x310] sm:$0xff] }
  0x95   :  { %v340_v29 = vld [vmem:[#allocation2 + $0x808] sm:$0xff]  ;;  %672 = vmatmul.f32.gmra.mxu3 %v1548_v53  ;;  %781 = vmatpush.msrb.mxu2 %v412_v25  ;;  %v261_v0 = vld [vmem:[#allocation2 + $0x590] sm:$0xff] }
  0x96   :  { %v408_v30 = vld [vmem:[#allocation2 + $0xa28] sm:$0xff]  ;;  %737 = vmatpush.msra.mxu1 %v276_v27  ;;  %760 = vmatpush.msra.mxu3 %v340_v29  ;;  %v313_v1 = vld [vmem:[#allocation2 + $0x730] sm:$0xff] }
  0x97   :  { %695 = vmatmul.f32.gmra.mxu2 %v1555_v58  ;;  %v404_v34 = vld [vmem:[#allocation2 + $0xa08] sm:$0xff]  ;;  %715 = vmatmul.f32.vlgmr.msra.gmra.mxu0 %v1519_v8  ;;  %v113_v2 = vld [vmem:[#allocation2 + $0xf0] sm:$0xff] }
  0x98   :  { %v472_v35 = vld [vmem:[#allocation2 + $0xc28] sm:$0xff]  ;;  %782 = vmatpush.msrb.mxu2 %v408_v30  ;;  %814 = vmatpush.msrb.mxu1 %v145_v31  ;;  %v177_v4 = vld [vmem:[#allocation2 + $0x2f0] sm:$0xff] }
  0x99   :  { %837 = vmatpush.msrb.mxu3 %v209_v32  ;;  %v468_v40 = vld [vmem:[#allocation2 + $0xc08] sm:$0xff]  ;;  %805 = vmatpush.msrb.mxu0 %v472_v35  ;;  %v257_v5 = vld [vmem:[#allocation2 + $0x570] sm:$0xff] }
  0x9a   :  { %783 = vmatpush.msrb.mxu2 %v404_v34  ;;  %815 = vmatpush.msrb.mxu1 %v141_v36  ;;  %v309_v6 = vld [vmem:[#allocation2 + $0x710] sm:$0xff] }
  0x9b   :  { %838 = vmatpush.msrb.mxu3 %v205_v37  ;;  %806 = vmatpush.msrb.mxu0 %v468_v40  ;;  %v109_v7 = vld [vmem:[#allocation2 + $0xd0] sm:$0xff] }
  0x9c   :  { %883 = vmatpush.msra.mxu2 %v337_v39  ;;  %816 = vmatpush.msrb.mxu1 %v137_v41  ;;  %v173_v11 = vld [vmem:[#allocation2 + $0x2d0] sm:$0xff] }
  0x9d   :  { %839 = vmatpush.msrb.mxu3 %v201_v42  ;;  %860 = vmatpush.msra.mxu0 %v273_v50  ;;  %v253_v12 = vld [vmem:[#allocation2 + $0x550] sm:$0xff] }
  0x9e   :  { %884 = vmatpush.msra.mxu2 %v333_v43  ;;  %761 = vmatmul.f32.vlgmr.msra.gmra.mxu3 %v1573_v10  ;;  %v305_v13 = vld [vmem:[#allocation2 + $0x6f0] sm:$0xff] }
  0x9f   :  { %817 = vmatpush.msrb.mxu1 %v133_v44  ;;  %840 = vmatpush.msrb.mxu3 %v197_v45  ;;  %v105_v14 = vld [vmem:[#allocation2 + $0xb0] sm:$0xff] }
  0xa0   :  { %885 = vmatpush.msra.mxu2 %v329_v46  ;;  %718 = vmatmul.f32.gmra.mxu0 %v1543_v48  ;;  %v169_v16 = vld [vmem:[#allocation2 + $0x2b0] sm:$0xff] }
  0xa1   :  { %784 = vmatmul.f32.vlgmr.msrb.gmra.mxu2 %v1580_v15  ;;  %818 = vmatpush.msrb.mxu1 %v129_v47  ;;  %v249_v18 = vld [vmem:[#allocation2 + $0x530] sm:$0xff] }
  0xa2   :  { %841 = vmatpush.msrb.mxu3 %v193_v49  ;;  %886 = vmatpush.msra.mxu2 %v325_v51  ;;  %v301_v20 = vld [vmem:[#allocation2 + $0x6d0] sm:$0xff] }
  0xa3   :  { %738 = vmatmul.f32.vlgmr.msra.gmra.mxu1 %v1530_v19  ;;  %861 = vmatpush.msra.mxu0 %v269_v55  ;;  %v101_v21 = vld [vmem:[#allocation2 + $0x90] sm:$0xff] }
  0xa4   :  { %819 = vmatpush.msrb.mxu1 %v125_v52  ;;  %842 = vmatpush.msrb.mxu3 %v189_v54  ;;  %v165_v22 = vld [vmem:[#allocation2 + $0x290] sm:$0xff]  ;;  %v146_v54 = vld [vmem:[#allocation2 + $0x1f8] sm:$0xff] }
  0xa5   :  { %887 = vmatpush.msra.mxu2 %v321_v56  ;;  %862 = vmatpush.msra.mxu0 %v265_v60  ;;  %v245_v23 = vld [vmem:[#allocation2 + $0x510] sm:$0xff] }
  0xa6   :  { %820 = vmatpush.msrb.mxu1 %v121_v57  ;;  %843 = vmatpush.msrb.mxu3 %v185_v59  ;;  %v297_v25 = vld [vmem:[#allocation2 + $0x6b0] sm:$0xff]  ;;  %v142_v59 = vld [vmem:[#allocation2 + $0x1d8] sm:$0xff] }
  0xa7   :  { %888 = vmatpush.msra.mxu2 %v317_v61  ;;  %764 = vmatmul.f32.gmra.mxu3 %v1591_v33  ;;  %v97_v26 = vld [vmem:[#allocation2 + $0x70] sm:$0xff] }
  0xa8   :  { %821 = vmatpush.msrb.mxu1 %v117_v62  ;;  %844 = vmatpush.msrb.mxu3 %v181_v63  ;;  %v161_v27 = vld [vmem:[#allocation2 + $0x270] sm:$0xff]  ;;  %v138_v63 = vld [vmem:[#allocation2 + $0x1b8] sm:$0xff] }
  0xa9   :  { %863 = vmatpush.msra.mxu0 %v261_v0  ;;  %889 = vmatpush.msra.mxu2 %v313_v1  ;;  %v241_v29 = vld [vmem:[#allocation2 + $0x4f0] sm:$0xff] }
  0xaa   :  { %1359 = vmatmul.msk.f32.vlgmr.msrb.gmra.mxu0 %vm485_vm0, %v1561_v3  ;;  %787 = vmatmul.f32.gmra.mxu2 %v1599_v38  ;;  %v293_v30 = vld [vmem:[#allocation2 + $0x690] sm:$0xff] }
  0xab   :  { %822 = vmatpush.msrb.mxu1 %v113_v2  ;;  %845 = vmatpush.msrb.mxu3 %v177_v4  ;;  %v93_v31 = vld [vmem:[#allocation2 + $0x50] sm:$0xff]  ;;  %v134_v4 = vld [vmem:[#allocation2 + $0x198] sm:$0xff] }
  0xac   :  { %864 = vmatpush.msra.mxu0 %v257_v5  ;;  %890 = vmatpush.msra.mxu2 %v309_v6  ;;  %v157_v32 = vld [vmem:[#allocation2 + $0x250] sm:$0xff] }
  0xad   :  { %741 = vmatmul.f32.gmra.mxu1 %v1568_v9  ;;  %846 = vmatpush.msrb.mxu3 %v173_v11  ;;  %v237_v34 = vld [vmem:[#allocation2 + $0x4d0] sm:$0xff]  ;;  %v130_v11 = vld [vmem:[#allocation2 + $0x178] sm:$0xff] }
  0xae   :  { %823 = vmatpush.msrb.mxu1 %v109_v7  ;;  %865 = vmatpush.msra.mxu0 %v253_v12  ;;  %v289_v35 = vld [vmem:[#allocation2 + $0x670] sm:$0xff]  ;;  %v210_v12 = vld [vmem:[#allocation2 + $0x3f8] sm:$0xff] }
  0xaf   :  { %891 = vmatpush.msra.mxu2 %v305_v13  ;;  %847 = vmatpush.msrb.mxu3 %v169_v16  ;;  %v89_v36 = vld [vmem:[#allocation2 + $0x30] sm:$0xff] }
  0xb0   :  { %824 = vmatpush.msrb.mxu1 %v105_v14  ;;  %866 = vmatpush.msra.mxu0 %v249_v18  ;;  %v153_v37 = vld [vmem:[#allocation2 + $0x230] sm:$0xff]  ;;  %v126_v14 = vld [vmem:[#allocation2 + $0x158] sm:$0xff] }
  0xb1   :  { %892 = vmatpush.msra.mxu2 %v301_v20  ;;  %848 = vmatpush.msrb.mxu3 %v165_v22  ;;  %v233_v39 = vld [vmem:[#allocation2 + $0x4b0] sm:$0xff]  ;;  %v206_v18 = vld [vmem:[#allocation2 + $0x3d8] sm:$0xff] }
  0xb2   :  { %825 = vmatpush.msrb.mxu1 %v101_v21  ;;  %867 = vmatpush.msra.mxu0 %v245_v23  ;;  %v285_v40 = vld [vmem:[#allocation2 + $0x650] sm:$0xff]  ;;  %v122_v21 = vld [vmem:[#allocation2 + $0x138] sm:$0xff] }
  0xb3   :  { %893 = vmatpush.msra.mxu2 %v297_v25  ;;  %1360 = vmatmul.msk.f32.gmra.mxu0 %vm485_vm0, %v1586_v28  ;;  %v85_v41 = vld [vmem:[#allocation2 + $0x10] sm:$0xff]  ;;  %v118_v23 = vld [vmem:[#allocation2 + $0x118] sm:$0xff] }
  0xb4   :  { %826 = vmatpush.msrb.mxu1 %v97_v26  ;;  %849 = vmatpush.msrb.mxu3 %v161_v27  ;;  %v149_v42 = vld [vmem:[#allocation2 + $0x210] sm:$0xff]  ;;  %v198_v26 = vld [vmem:[#allocation2 + $0x398] sm:$0xff] }
  0xb5   :  { %868 = vmatpush.msra.mxu0 %v241_v29  ;;  %894 = vmatpush.msra.mxu2 %v293_v30  ;;  %v229_v43 = vld [vmem:[#allocation2 + $0x490] sm:$0xff]  ;;  %v194_v30 = vld [vmem:[#allocation2 + $0x378] sm:$0xff] }
  0xb6   :  { %827 = vmatpush.msrb.mxu1 %v93_v31  ;;  %850 = vmatpush.msrb.mxu3 %v157_v32  ;;  %v281_v44 = vld [vmem:[#allocation2 + $0x630] sm:$0xff]  ;;  %v110_v32 = vld [vmem:[#allocation2 + $0xd8] sm:$0xff] }
  0xb7   :  { %869 = vmatpush.msra.mxu0 %v237_v34  ;;  %895 = vmatpush.msra.mxu2 %v289_v35  ;;  %v401_v45 = vld [vmem:[#allocation2 + $0x9f0] sm:$0xff]  ;;  %v190_v35 = vld [vmem:[#allocation2 + $0x358] sm:$0xff] }
  0xb8   :  { %828 = vmatpush.msrb.mxu1 %v89_v36  ;;  %851 = vmatpush.msrb.mxu3 %v153_v37  ;;  %v465_v46 = vld [vmem:[#allocation2 + $0xbf0] sm:$0xff]  ;;  %v106_v37 = vld [vmem:[#allocation2 + $0xb8] sm:$0xff] }
  0xb9   :  { %870 = vmatpush.msra.mxu0 %v233_v39  ;;  %896 = vmatpush.msra.mxu2 %v285_v40  ;;  %v225_v47 = vld [vmem:[#allocation2 + $0x470] sm:$0xff]  ;;  %v186_v39 = vld [vmem:[#allocation2 + $0x338] sm:$0xff] }
  0xba   :  { %829 = vmatpush.msrb.mxu1 %v85_v41  ;;  %852 = vmatpush.msrb.mxu3 %v149_v42  ;;  %v277_v49 = vld [vmem:[#allocation2 + $0x610] sm:$0xff]  ;;  %v102_v42 = vld [vmem:[#allocation2 + $0x98] sm:$0xff] }
  0xbb   :  { %871 = vmatpush.msra.mxu0 %v229_v43  ;;  %v397_v50 = vld [vmem:[#allocation2 + $0x9d0] sm:$0xff]  ;;  %897 = vmatpush.msra.mxu2 %v281_v44  ;;  %v182_v43 = vld [vmem:[#allocation2 + $0x318] sm:$0xff] }
  0xbc   :  { %906 = vmatpush.msra.mxu1 %v401_v45  ;;  %v461_v51 = vld [vmem:[#allocation2 + $0xbd0] sm:$0xff]  ;;  %929 = vmatpush.msra.mxu3 %v465_v46  ;;  %v98_v46 = vld [vmem:[#allocation2 + $0x78] sm:$0xff] }
  0xbd   :  { %v221_v52 = vld [vmem:[#allocation2 + $0x450] sm:$0xff]  ;;  %872 = vmatpush.msra.mxu0 %v225_v47  ;;  %898 = vmatpush.msra.mxu2 %v277_v49  ;;  %v178_v47 = vld [vmem:[#allocation2 + $0x2f8] sm:$0xff] }
  0xbe   :  { %v393_v55 = vld [vmem:[#allocation2 + $0x9b0] sm:$0xff]  ;;  %907 = vmatpush.msra.mxu1 %v397_v50  ;;  %930 = vmatpush.msra.mxu3 %v461_v51  ;;  %v94_v51 = vld [vmem:[#allocation2 + $0x58] sm:$0xff] }
  0xbf   :  { %v457_v56 = vld [vmem:[#allocation2 + $0xbb0] sm:$0xff]  ;;  %873 = vmatpush.msra.mxu0 %v221_v52  ;;  %975 = vmatpush.msrb.mxu2 %v146_v54  ;;  %v90_v54 = vld [vmem:[#allocation2 + $0x38] sm:$0xff] }
  0xc0   :  { %v217_v57 = vld [vmem:[#allocation2 + $0x430] sm:$0xff]  ;;  %908 = vmatpush.msra.mxu1 %v393_v55  ;;  %931 = vmatpush.msra.mxu3 %v457_v56  ;;  %v170_v55 = vld [vmem:[#allocation2 + $0x2b8] sm:$0xff] }
  0xc1   :  { %v389_v60 = vld [vmem:[#allocation2 + $0x990] sm:$0xff]  ;;  %874 = vmatpush.msra.mxu0 %v217_v57  ;;  %976 = vmatpush.msrb.mxu2 %v142_v59  ;;  %v274_v56 = vld [vmem:[#allocation2 + $0x5f8] sm:$0xff] }
  0xc2   :  { %v453_v61 = vld [vmem:[#allocation2 + $0xb90] sm:$0xff]  ;;  %853 = vmatmul.f32.vlgmr.msrb.gmra.mxu3 %v1537_v24  ;;  %909 = vmatpush.msra.mxu1 %v389_v60  ;;  %v338_v57 = vld [vmem:[#allocation2 + $0x7f8] sm:$0xff] }
  0xc3   :  { %v213_v62 = vld [vmem:[#allocation2 + $0x410] sm:$0xff]  ;;  %932 = vmatpush.msra.mxu3 %v453_v61  ;;  %977 = vmatpush.msrb.mxu2 %v138_v63  ;;  %v86_v59 = vld [vmem:[#allocation2 + $0x18] sm:$0xff] }
  0xc4   :  { %v385_v0 = vld [vmem:[#allocation2 + $0x970] sm:$0xff]  ;;  %875 = vmatpush.msra.mxu0 %v213_v62  ;;  %830 = vmatmul.f32.vlgmr.msrb.gmra.mxu1 %v1525_v17  ;;  %v166_v60 = vld [vmem:[#allocation2 + $0x298] sm:$0xff] }
  0xc5   :  { %v449_v1 = vld [vmem:[#allocation2 + $0xb70] sm:$0xff]  ;;  %910 = vmatpush.msra.mxu1 %v385_v0  ;;  %978 = vmatpush.msrb.mxu2 %v134_v4  ;;  %v270_v61 = vld [vmem:[#allocation2 + $0x5d8] sm:$0xff] }
  0xc6   :  { %v473_v2 = vld [vmem:[#allocation2 + $0xc30] sm:$0xff]  ;;  %933 = vmatpush.msra.mxu3 %v449_v1  ;;  %899 = vmatmul.f32.vlgmr.msra.gmra.mxu2 %v1530_v19  ;;  %v202_v19 = vld [vmem:[#allocation2 + $0x3b8] sm:$0xff] }
  0xc7   :  { %v381_v5 = vld [vmem:[#allocation2 + $0x950] sm:$0xff]  ;;  %966 = vmatpush.msrb.mxu0 %v473_v2  ;;  %979 = vmatpush.msrb.mxu2 %v130_v11  ;;  %v334_v62 = vld [vmem:[#allocation2 + $0x7d8] sm:$0xff] }
  0xc8   :  { %v445_v6 = vld [vmem:[#allocation2 + $0xb50] sm:$0xff]  ;;  %911 = vmatpush.msra.mxu1 %v381_v5  ;;  %876 = vmatmul.f32.vlgmr.msra.gmra.mxu0 %v1519_v8  ;;  %v114_v8 = vld [vmem:[#allocation2 + $0xf8] sm:$0xff] }
  0xc9   :  { %v469_v7 = vld [vmem:[#allocation2 + $0xc10] sm:$0xff]  ;;  %934 = vmatpush.msra.mxu3 %v445_v6  ;;  %980 = vmatpush.msrb.mxu2 %v126_v14  ;;  %v402_v63 = vld [vmem:[#allocation2 + $0x9f8] sm:$0xff] }
  0xca   :  { %v377_v24 = vld [vmem:[#allocation2 + $0x930] sm:$0xff]  ;;  %967 = vmatpush.msrb.mxu0 %v469_v7  ;;  %856 = vmatmul.f32.gmra.mxu3 %v1555_v58  ;;  %v162_v0 = vld [vmem:[#allocation2 + $0x278] sm:$0xff] }
  0xcb   :  { %v441_v13 = vld [vmem:[#allocation2 + $0xb30] sm:$0xff]  ;;  %912 = vmatpush.msra.mxu1 %v377_v24  ;;  %981 = vmatpush.msrb.mxu2 %v122_v21  ;;  %v330_v1 = vld [vmem:[#allocation2 + $0x7b8] sm:$0xff] }
  0xcc   :  { %v373_v16 = vld [vmem:[#allocation2 + $0x910] sm:$0xff]  ;;  %998 = vmatpush.msra.mxu0 %v210_v12  ;;  %935 = vmatpush.msra.mxu3 %v441_v13  ;;  %v262_v2 = vld [vmem:[#allocation2 + $0x598] sm:$0xff] }
  0xcd   :  { %v437_v20 = vld [vmem:[#allocation2 + $0xb10] sm:$0xff]  ;;  %913 = vmatpush.msra.mxu1 %v373_v16  ;;  %982 = vmatpush.msrb.mxu2 %v118_v23  ;;  %v326_v4 = vld [vmem:[#allocation2 + $0x798] sm:$0xff] }
  0xce   :  { %v369_v17 = vld [vmem:[#allocation2 + $0x8f0] sm:$0xff]  ;;  %999 = vmatpush.msra.mxu0 %v206_v18  ;;  %936 = vmatpush.msra.mxu3 %v437_v20  ;;  %v394_v5 = vld [vmem:[#allocation2 + $0x9b8] sm:$0xff] }
  0xcf   :  { %v433_v22 = vld [vmem:[#allocation2 + $0xaf0] sm:$0xff]  ;;  %914 = vmatpush.msra.mxu1 %v369_v17  ;;  %983 = vmatpush.msrb.mxu2 %v114_v8  ;;  %v154_v6 = vld [vmem:[#allocation2 + $0x238] sm:$0xff] }
  0xd0   :  { %v365_v25 = vld [vmem:[#allocation2 + $0x8d0] sm:$0xff]  ;;  %1000 = vmatpush.msra.mxu0 %v202_v19  ;;  %937 = vmatpush.msra.mxu3 %v433_v22  ;;  %v322_v7 = vld [vmem:[#allocation2 + $0x778] sm:$0xff] }
  0xd1   :  { %v429_v27 = vld [vmem:[#allocation2 + $0xad0] sm:$0xff]  ;;  %915 = vmatpush.msra.mxu1 %v365_v25  ;;  %984 = vmatpush.msrb.mxu2 %v110_v32  ;;  %v390_v11 = vld [vmem:[#allocation2 + $0x998] sm:$0xff] }
  0xd2   :  { %v361_v29 = vld [vmem:[#allocation2 + $0x8b0] sm:$0xff]  ;;  %1001 = vmatpush.msra.mxu0 %v198_v26  ;;  %938 = vmatpush.msra.mxu3 %v429_v27  ;;  %v150_v24 = vld [vmem:[#allocation2 + $0x218] sm:$0xff] }
  0xd3   :  { %v425_v31 = vld [vmem:[#allocation2 + $0xab0] sm:$0xff]  ;;  %916 = vmatpush.msra.mxu1 %v361_v29  ;;  %985 = vmatpush.msrb.mxu2 %v106_v37  ;;  %v254_v12 = vld [vmem:[#allocation2 + $0x558] sm:$0xff] }
  0xd4   :  { %v357_v34 = vld [vmem:[#allocation2 + $0x890] sm:$0xff]  ;;  %1002 = vmatpush.msra.mxu0 %v194_v30  ;;  %939 = vmatpush.msra.mxu3 %v425_v31  ;;  %v318_v13 = vld [vmem:[#allocation2 + $0x758] sm:$0xff] }
  0xd5   :  { %v421_v36 = vld [vmem:[#allocation2 + $0xa90] sm:$0xff]  ;;  %917 = vmatpush.msra.mxu1 %v357_v34  ;;  %986 = vmatpush.msrb.mxu2 %v102_v42  ;;  %v386_v14 = vld [vmem:[#allocation2 + $0x978] sm:$0xff]  ;;  %v1634_v25 = vpop.f32.mrf.mxu0 }
  0xd6   :  { %1003 = vmatpush.msra.mxu0 %v190_v35  ;;  %940 = vmatpush.msra.mxu3 %v421_v36  ;;  %v353_v40 = vld [vmem:[#allocation2 + $0x870] sm:$0xff]  ;;  %v466_v16 = vld [vmem:[#allocation2 + $0xbf8] sm:$0xff]  ;;  %v1372_v36 = vld [vmem:[%s1969_s0] sm:$0xff] }
  0xd7   :  { %v417_v41 = vld [vmem:[#allocation2 + $0xa70] sm:$0xff]  ;;  %833 = vmatmul.f32.gmra.mxu1 %v1548_v53  ;;  %v174_v53 = vld [vmem:[#allocation2 + $0x2d8] sm:$0xff]  ;;  %987 = vmatpush.msrb.mxu2 %v98_v46 }
  0xd8   :  { %1004 = vmatpush.msra.mxu0 %v186_v39  ;;  %v349_v44 = vld [vmem:[#allocation2 + $0x850] sm:$0xff]  ;;  %918 = vmatpush.msra.mxu1 %v353_v40  ;;  %v250_v18 = vld [vmem:[#allocation2 + $0x538] sm:$0xff] }
  0xd9   :  { %v413_v45 = vld [vmem:[#allocation2 + $0xa50] sm:$0xff]  ;;  %941 = vmatpush.msra.mxu3 %v417_v41  ;;  %988 = vmatpush.msrb.mxu2 %v94_v51  ;;  %v314_v20 = vld [vmem:[#allocation2 + $0x738] sm:$0xff] }
  0xda   :  { %1005 = vmatpush.msra.mxu0 %v182_v43  ;;  %v345_v49 = vld [vmem:[#allocation2 + $0x830] sm:$0xff]  ;;  %919 = vmatpush.msra.mxu1 %v349_v44  ;;  %v382_v21 = vld [vmem:[#allocation2 + $0x958] sm:$0xff] }
  0xdb   :  { %v409_v50 = vld [vmem:[#allocation2 + $0xa30] sm:$0xff]  ;;  %942 = vmatpush.msra.mxu3 %v413_v45  ;;  %879 = vmatmul.f32.gmra.mxu0 %v1543_v48  ;;  %v266_v48 = vld [vmem:[#allocation2 + $0x5b8] sm:$0xff] }
  0xdc   :  { %1006 = vmatpush.msra.mxu0 %v178_v47  ;;  %v341_v58 = vld [vmem:[#allocation2 + $0x810] sm:$0xff]  ;;  %920 = vmatpush.msra.mxu1 %v345_v49  ;;  %v246_v17 = vld [vmem:[#allocation2 + $0x518] sm:$0xff] }
  0xdd   :  { %v405_v52 = vld [vmem:[#allocation2 + $0xa10] sm:$0xff]  ;;  %943 = vmatpush.msra.mxu3 %v409_v50  ;;  %989 = vmatpush.msrb.mxu2 %v90_v54  ;;  %v310_v19 = vld [vmem:[#allocation2 + $0x718] sm:$0xff]  ;;  %v1645_v50 = vpop.f32.mrf.mxu1 }
  0xde   :  { %1007 = vmatpush.msra.mxu0 %v174_v53  ;;  %921 = vmatpush.msra.mxu1 %v341_v58  ;;  %v378_v22 = vld [vmem:[#allocation2 + $0x938] sm:$0xff] }
  0xdf   :  { %944 = vmatpush.msra.mxu3 %v405_v52  ;;  %922 = vmatmul.f32.vlgmr.msra.gmra.mxu1 %v1573_v10  ;;  %v398_v10 = vld [vmem:[#allocation2 + $0x9d8] sm:$0xff] }
  0xe0   :  { %945 = vmatmul.f32.vlgmr.msra.gmra.mxu3 %v1580_v15  ;;  %1008 = vmatpush.msra.mxu0 %v170_v55  ;;  %v158_v15 = vld [vmem:[#allocation2 + $0x258] sm:$0xff] }
  0xe1   :  { %1021 = vmatpush.msrb.mxu1 %v274_v56  ;;  %1044 = vmatpush.msrb.mxu3 %v338_v57  ;;  %v242_v23 = vld [vmem:[#allocation2 + $0x4f8] sm:$0xff]  ;;  %v1650_v56 = vpop.f32.mrf.mxu3  ;;  %v1374_v57 = vld [vmem:[%s1969_s0 + $0x8] sm:$0xff] }
  0xe2   :  { %902 = vmatmul.f32.gmra.mxu2 %v1568_v9  ;;  %1009 = vmatpush.msra.mxu0 %v166_v60  ;;  %v258_v9 = vld [vmem:[#allocation2 + $0x578] sm:$0xff] }
  0xe3   :  { %990 = vmatpush.msrb.mxu2 %v86_v59  ;;  %1022 = vmatpush.msrb.mxu1 %v270_v61  ;;  %v306_v26 = vld [vmem:[#allocation2 + $0x6f8] sm:$0xff] }
  0xe4   :  { %1045 = vmatpush.msrb.mxu3 %v334_v62  ;;  %1010 = vmatpush.msra.mxu0 %v162_v0  ;;  %v374_v27 = vld [vmem:[#allocation2 + $0x918] sm:$0xff] }
  0xe5   :  { %1067 = vmatpush.msra.mxu2 %v402_v63  ;;  %1023 = vmatpush.msrb.mxu1 %v266_v48  ;;  %v454_v8 = vld [vmem:[#allocation2 + $0xb98] sm:$0xff] }
  0xe6   :  { %1046 = vmatpush.msrb.mxu3 %v330_v1  ;;  %1011 = vmatpush.msra.mxu0 %v158_v15  ;;  %v238_v29 = vld [vmem:[#allocation2 + $0x4d8] sm:$0xff]  ;;  %v1643_v44 = vpop.f32.mrf.mxu0  ;;  %v1657_v1 = vld [vmem:[#allocation4] sm:$0xf] }
  0xe7   :  { %1068 = vmatpush.msra.mxu2 %v398_v10  ;;  %1024 = vmatpush.msrb.mxu1 %v262_v2  ;;  %v302_v30 = vld [vmem:[#allocation2 + $0x6d8] sm:$0xff] }
  0xe8   :  { %1047 = vmatpush.msrb.mxu3 %v326_v4  ;;  %1361 = vmatmul.msk.f32.vlgmr.msrb.gmra.mxu0 %vm485_vm0, %v1561_v3  ;;  %v462_v3 = vld [vmem:[#allocation2 + $0xbd8] sm:$0xff]  ;;  %v1661_v4 = vpop.f32.mrf.mxu1 }
  0xe9   :  { %1069 = vmatpush.msra.mxu2 %v394_v5  ;;  %948 = vmatmul.f32.gmra.mxu3 %v1599_v38  ;;  %v1632_v38 = vpop.f32.mrf.mxu2  ;;  %v370_v31 = vld [vmem:[#allocation2 + $0x8f8] sm:$0xff]  ;;  %v1375_v5 = vld [vmem:[%s1969_s0 + $0x10] sm:$0xff] }
  0xea   :  { %1025 = vmatpush.msrb.mxu1 %v258_v9  ;;  %1012 = vmatpush.msra.mxu0 %v154_v6  ;;  %v450_v32 = vld [vmem:[#allocation2 + $0xb78] sm:$0xff] }
  0xeb   :  { %1048 = vmatpush.msrb.mxu3 %v322_v7  ;;  %925 = vmatmul.f32.gmra.mxu1 %v1591_v33  ;;  %v458_v33 = vld [vmem:[#allocation2 + $0xbb8] sm:$0xff] }
  0xec   :  { %1070 = vmatpush.msra.mxu2 %v390_v11  ;;  %1013 = vmatpush.msra.mxu0 %v150_v24  ;;  %v234_v34 = vld [vmem:[#allocation2 + $0x4b8] sm:$0xff]  ;;  %v477_v24 = vperm.slane %v1657_v1, 0 }
  0xed   :  { %1026 = vmatpush.msrb.mxu1 %v254_v12  ;;  %1049 = vmatpush.msrb.mxu3 %v318_v13  ;;  %v298_v37 = vld [vmem:[#allocation2 + $0x6b8] sm:$0xff]  ;;  %v1158_v12 = vld [vmem:[%s1972_s3 + $0x70] sm:$0xff] }
  0xee   :  { %1071 = vmatpush.msra.mxu2 %v386_v14  ;;  %1090 = vmatpush.msrb.mxu0 %v466_v16  ;;  %v366_v39 = vld [vmem:[#allocation2 + $0x8d8] sm:$0xff] }
  0xef   :  { %1027 = vmatpush.msrb.mxu1 %v250_v18  ;;  %1050 = vmatpush.msrb.mxu3 %v314_v20  ;;  %v230_v40 = vld [vmem:[#allocation2 + $0x498] sm:$0xff]  ;;  %v1659_v2 = vpop.f32.mrf.mxu0  ;;  %v1377_v18 = vld [vmem:[%s1969_s0 + $0x20] sm:$0xff]  ;;  %v1157_v20 = vld [vmem:[%s1972_s3 + $0x68] sm:$0xff] }
  0xf0   :  { %1072 = vmatpush.msra.mxu2 %v382_v21  ;;  %1091 = vmatpush.msrb.mxu0 %v462_v3  ;;  %v294_v41 = vld [vmem:[#allocation2 + $0x698] sm:$0xff]  ;;  %v1378_v3 = vld [vmem:[%s1969_s0 + $0x40] sm:$0xff] }
  0xf1   :  { %1028 = vmatpush.msrb.mxu1 %v246_v17  ;;  %1051 = vmatpush.msrb.mxu3 %v310_v19  ;;  %v1638_v35 = vpop.f32.mrf.mxu2  ;;  %v362_v42 = vld [vmem:[#allocation2 + $0x8b8] sm:$0xff] }
  0xf2   :  { %1073 = vmatpush.msra.mxu2 %v378_v22  ;;  %1092 = vmatpush.msrb.mxu0 %v458_v33  ;;  %v442_v43 = vld [vmem:[#allocation2 + $0xb38] sm:$0xff]  ;;  %v510_v22 = vadd.f32 %v1634_v25, %v477_v24  ;;  %v1156_v33 = vld [vmem:[%s1972_s3 + $0x60] sm:$0xff] }
  0xf3   :  { %1029 = vmatpush.msrb.mxu1 %v242_v23  ;;  %1362 = vmatmul.msk.f32.gmra.mxu0 %vm485_vm0, %v1586_v28  ;;  %v446_v28 = vld [vmem:[#allocation2 + $0xb58] sm:$0xff]  ;;  %v1174_v23 = vld [vmem:[%s1972_s3 + $0xf0] sm:$0xff] }
  0xf4   :  { %1052 = vmatpush.msrb.mxu3 %v306_v26  ;;  %1074 = vmatpush.msra.mxu2 %v374_v27  ;;  %v226_v45 = vld [vmem:[#allocation2 + $0x478] sm:$0xff]  ;;  %v1379_v27 = vld [vmem:[%s1969_s0 + $0x48] sm:$0xff] }
  0xf5   :  { %1093 = vmatpush.msrb.mxu0 %v454_v8  ;;  %991 = vmatmul.f32.vlgmr.msrb.gmra.mxu2 %v1372_v36  ;;  %v290_v46 = vld [vmem:[#allocation2 + $0x678] sm:$0xff]  ;;  %v1173_v8 = vld [vmem:[%s1972_s3 + $0xe8] sm:$0xff]  ;;  %v1154_v36 = vld [vmem:[%s1972_s3 + $0x50] sm:$0xff] }
  0xf6   :  { %1030 = vmatpush.msrb.mxu1 %v238_v29  ;;  %1053 = vmatpush.msrb.mxu3 %v302_v30  ;;  %v358_v47 = vld [vmem:[#allocation2 + $0x898] sm:$0xff]  ;;  %v1676_v14 = vpop.f32.mrf.mxu3 }
  0xf7   :  { %1075 = vmatpush.msra.mxu2 %v370_v31  ;;  %1094 = vmatpush.msrb.mxu0 %v450_v32  ;;  %v438_v49 = vld [vmem:[#allocation2 + $0xb18] sm:$0xff]  ;;  %v533_v31 = vadd.f32 %v1645_v50, %v510_v22  ;;  %v624_v32 = vpop.f32.mrf.mxu1  ;;  %v1383_v50 = vld [vmem:[%s1969_s0 + $0x30] sm:$0xff] }
  0xf8   :  { %1031 = vmatpush.msrb.mxu1 %v234_v34  ;;  %1054 = vmatpush.msrb.mxu3 %v298_v37  ;;  %v222_v51 = vld [vmem:[#allocation2 + $0x458] sm:$0xff]  ;;  %v1380_v34 = vld [vmem:[%s1969_s0 + $0x50] sm:$0xff] }
  0xf9   :  { %1076 = vmatpush.msra.mxu2 %v366_v39  ;;  %1095 = vmatpush.msrb.mxu0 %v446_v28  ;;  %v286_v53 = vld [vmem:[#allocation2 + $0x658] sm:$0xff]  ;;  %v1655_v61 = vpop.f32.mrf.mxu2  ;;  %v1172_v39 = vld [vmem:[%s1972_s3 + $0xe0] sm:$0xff]  ;;  %v513_v28 = vadd.f32 %v1643_v44, %v477_v24  ;;  %v556_v44 = vadd.f32 %v1632_v38, %v533_v31  ;;  %v1166_v24 = vld [vmem:[%s1972_s3 + $0xb0] sm:$0xff] }
  0xfa   :  { %1032 = vmatpush.msrb.mxu1 %v230_v40  ;;  %1055 = vmatpush.msrb.mxu3 %v294_v41  ;;  %v354_v58 = vld [vmem:[#allocation2 + $0x878] sm:$0xff]  ;;  %v1708_v29 = vpop.f32.mrf.mxu0  ;;  %v1153_v41 = vld [vmem:[%s1972_s3 + $0x48] sm:$0xff] }
  0xfb   :  { %1077 = vmatpush.msra.mxu2 %v362_v42  ;;  %1096 = vmatpush.msrb.mxu0 %v442_v43  ;;  %v1373_v52 = vld [vmem:[%s1969_s0 + $0x38] sm:$0xff]  ;;  %v1382_v42 = vld [vmem:[%s1969_s0 + $0x28] sm:$0xff]  ;;  %v478_v43 = vperm.slane %v1657_v1, 1 }
  0xfc   :  { %1033 = vmatpush.msrb.mxu1 %v226_v45  ;;  %1056 = vmatpush.msrb.mxu3 %v290_v46  ;;  %v434_v54 = vld [vmem:[#allocation2 + $0xaf8] sm:$0xff]  ;;  %v1152_v46 = vld [vmem:[%s1972_s3 + $0x40] sm:$0xff] }
  0xfd   :  { %1078 = vmatpush.msra.mxu2 %v358_v47  ;;  %1097 = vmatpush.msrb.mxu0 %v438_v49  ;;  %v218_v55 = vld [vmem:[#allocation2 + $0x438] sm:$0xff]  ;;  %v536_v49 = vadd.f32 %v1661_v4, %v513_v28  ;;  %v1385_v4 = vld [vmem:[%s1969_s0 + $0x68] sm:$0xff] }
  0xfe   :  { %994 = vmatmul.f32.gmra.mxu2 %v1373_v52  ;;  %1014 = vmatmul.f32.vlgmr.msra.gmra.mxu0 %v1374_v57  ;;  %v282_v59 = vld [vmem:[#allocation2 + $0x638] sm:$0xff]  ;;  %v579_v52 = vadd.f32 %v1650_v56, %v556_v44  ;;  %v1188_v44 = vld [vmem:[%s1972_s3 + $0x160] sm:$0xff] }
  0xff   :  { %1034 = vmatpush.msrb.mxu1 %v222_v51  ;;  %v350_v60 = vld [vmem:[#allocation2 + $0x858] sm:$0xff]  ;;  %1057 = vmatpush.msrb.mxu3 %v286_v53  ;;  %v1170_v51 = vld [vmem:[%s1972_s3 + $0xd0] sm:$0xff]  ;;  %v559_v57 = vadd.f32 %v1638_v35, %v536_v49  ;;  %v1168_v35 = vld [vmem:[%s1972_s3 + $0xc0] sm:$0xff] }
 0x100   :  { %1079 = vmatpush.msra.mxu2 %v354_v58  ;;  %v430_v62 = vld [vmem:[#allocation2 + $0xad8] sm:$0xff]  ;;  %1098 = vmatpush.msrb.mxu0 %v434_v54  ;;  %v1150_v54 = vld [vmem:[%s1972_s3 + $0x30] sm:$0xff] }
 0x101   :  { %v214_v63 = vld [vmem:[#allocation2 + $0x418] sm:$0xff]  ;;  %1035 = vmatpush.msrb.mxu1 %v218_v55  ;;  %1058 = vmatpush.msrb.mxu3 %v282_v59  ;;  %v1690_v19 = vpop.f32.mrf.mxu2  ;;  %v1169_v55 = vld [vmem:[%s1972_s3 + $0xc8] sm:$0xff]  ;;  %v602_v59 = vadd.f32 %v1659_v2, %v579_v52  ;;  %v582_v2 = vadd.f32 %v1676_v14, %v559_v57  ;;  %v1182_v57 = vld [vmem:[%s1972_s3 + $0x130] sm:$0xff] }
 0x102   :  { %v278_v0 = vld [vmem:[#allocation2 + $0x618] sm:$0xff]  ;;  %1080 = vmatpush.msra.mxu2 %v350_v60  ;;  %1099 = vmatpush.msrb.mxu0 %v430_v62  ;;  %v627_v60 = vpop.f32.mrf.mxu1  ;;  %v1149_v62 = vld [vmem:[%s1972_s3 + $0x28] sm:$0xff] }
 0x103   :  { %v346_v48 = vld [vmem:[#allocation2 + $0x838] sm:$0xff]  ;;  %1036 = vmatpush.msrb.mxu1 %v214_v63  ;;  %1059 = vmatpush.msrb.mxu3 %v278_v0  ;;  %v1384_v63 = vld [vmem:[%s1969_s0 + $0x60] sm:$0xff]  ;;  %v605_v14 = vadd.f32 %v1708_v29, %v582_v2  ;;  %v1162_v29 = vld [vmem:[%s1972_s3 + $0x90] sm:$0xff] }
 0x104   :  { %v426_v10 = vld [vmem:[#allocation2 + $0xab8] sm:$0xff]  ;;  %1037 = vmatmul.f32.vlgmr.msrb.gmra.mxu1 %v1375_v5  ;;  %1081 = vmatpush.msra.mxu2 %v346_v48  ;;  %v1148_v48 = vld [vmem:[%s1972_s3 + $0x20] sm:$0xff]  ;;  %v1185_v52 = vld [vmem:[%s1972_s3 + $0x148] sm:$0xff] }
 0x105   :  { %v474_v15 = vld [vmem:[#allocation2 + $0xc38] sm:$0xff]  ;;  %1100 = vmatpush.msrb.mxu0 %v426_v10 }
 0x106   :  { %v1159_v9 = vld [vmem:[%s1972_s3 + $0x78] sm:$0xff]  ;;  %1127 = vmatpush.msra.mxu1 %v474_v15  ;;  %1017 = vmatmul.f32.gmra.mxu0 %v1378_v3  ;;  %v625_v15 = vadd.f32 %v624_v32, %v602_v59  ;;  %v1181_v59 = vld [vmem:[%s1972_s3 + $0x128] sm:$0xff] }
 0x107   :  { %v342_v6 = vld [vmem:[#allocation2 + $0x818] sm:$0xff]  ;;  %1212 = vmatpush.msra.mxu3 %v1159_v9 }
 0x108   :  { %v1376_v7 = vld [vmem:[%s1969_s0 + $0x18] sm:$0xff]  ;;  %1082 = vmatpush.msra.mxu2 %v342_v6 }
 0x109   :  { %1060 = vmatmul.f32.vlgmr.msrb.gmra.mxu3 %v1376_v7  ;;  %v422_v11 = vld [vmem:[#allocation2 + $0xa98] sm:$0xff]  ;;  %1083 = vmatmul.f32.vlgmr.msra.gmra.mxu2 %v1377_v18 }
 0x10a   :  { %v418_v13 = vld [vmem:[#allocation2 + $0xa78] sm:$0xff]  ;;  %1101 = vmatpush.msrb.mxu0 %v422_v11  ;;  %1213 = vmatpush.msra.mxu3 %v1158_v12  ;;  %v1146_v11 = vld [vmem:[%s1972_s3 + $0x10] sm:$0xff] }
 0x10b   :  { %v470_v16 = vld [vmem:[#allocation2 + $0xc18] sm:$0xff] }
 0x10c   :  { %v1175_v21 = vld [vmem:[%s1972_s3 + $0xf8] sm:$0xff]  ;;  %1102 = vmatpush.msrb.mxu0 %v418_v13  ;;  %1128 = vmatpush.msra.mxu1 %v470_v16  ;;  %v648_v13 = vadd.f32 %v1655_v61, %v625_v15  ;;  %v1145_v16 = vld [vmem:[%s1972_s3 + $0x8] sm:$0xff]  ;;  %v1164_v61 = vld [vmem:[%s1972_s3 + $0xa0] sm:$0xff] }
 0x10d   :  { %v414_v17 = vld [vmem:[#allocation2 + $0xa58] sm:$0xff]  ;;  %1214 = vmatpush.msra.mxu3 %v1157_v20  ;;  %1040 = vmatmul.f32.gmra.mxu1 %v1379_v27  ;;  %v1165_v20 = vld [vmem:[%s1972_s3 + $0xa8] sm:$0xff] }
 0x10e   :  { %v410_v26 = vld [vmem:[#allocation2 + $0xa38] sm:$0xff]  ;;  %1235 = vmatpush.msrb.mxu1 %v1175_v21  ;;  %1103 = vmatpush.msrb.mxu0 %v414_v17  ;;  %v1144_v17 = vld [vmem:[%s1972_s3] sm:$0xff] }
 0x10f   :  { %v1155_v25 = vld [vmem:[%s1972_s3 + $0x58] sm:$0xff]  ;;  %1215 = vmatpush.msra.mxu3 %v1156_v33  ;;  %v670_v37 = vpop.f32.mrf.mxu3 }
 0x110   :  { %v406_v30 = vld [vmem:[#allocation2 + $0xa18] sm:$0xff]  ;;  %1236 = vmatpush.msrb.mxu1 %v1174_v23  ;;  %1104 = vmatpush.msrb.mxu0 %v410_v26  ;;  %v671_v53 = vadd.f32 %v670_v37, %v478_v43  ;;  %v1136_v23 = vmax.f32 %v648_v13, 0.0  ;;  %v628_v26 = vadd.f32 %v627_v60, %v605_v14  ;;  %v1161_v37 = vld [vmem:[%s1972_s3 + $0x88] sm:$0xff]  ;;  %v1180_v60 = vld [vmem:[%s1972_s3 + $0x120] sm:$0xff] }
 0x111   :  { %1063 = vmatmul.f32.gmra.mxu3 %v1380_v34  ;;  %v1381_v40 = vld [vmem:[%s1969_s0 + $0x58] sm:$0xff]  ;;  %v693_v45 = vpop.f32.mrf.mxu2 }
 0x112   :  { %1216 = vmatpush.msra.mxu3 %v1155_v25  ;;  %1237 = vmatpush.msrb.mxu1 %v1173_v8  ;;  %v1171_v47 = vld [vmem:[%s1972_s3 + $0xd8] sm:$0xff]  ;;  %v694_v0 = vadd.f32 %v693_v45, %v671_v53  ;;  %v651_v34 = vadd.f32 %v1690_v19, %v628_v26 }
 0x113   :  { %1105 = vmatpush.msrb.mxu0 %v406_v30  ;;  %1086 = vmatmul.f32.gmra.mxu2 %v1381_v40  ;;  %v1151_v38 = vld [vmem:[%s1972_s3 + $0x38] sm:$0xff] }
 0x114   :  { %1217 = vmatpush.msra.mxu3 %v1154_v36  ;;  %1106 = vmatmul.f32.vlgmr.msrb.gmra.mxu0 %v1382_v42  ;;  %v716_v58 = vpop.f32.mrf.mxu0  ;;  %v1147_v5 = vld [vmem:[%s1972_s3 + $0x18] sm:$0xff]  ;;  %v1140_v45 = vmax.f32 %v651_v34, 0.0 }
 0x115   :  { %1238 = vmatpush.msrb.mxu1 %v1172_v39  ;;  %v1167_v9 = vld [vmem:[%s1972_s3 + $0xb8] sm:$0xff]  ;;  %v717_v6 = vadd.f32 %v716_v58, %v694_v0  ;;  %v1190_v39 = vld [vmem:[%s1972_s3 + $0x170] sm:$0xff]  ;;  %v1176_v0 = vld [vmem:[%s1972_s3 + $0x100] sm:$0xff] }
 0x116   :  { %1218 = vmatpush.msra.mxu3 %v1153_v41  ;;  %1363 = vmatmul.msk.f32.vlgmr.msra.gmra.mxu1 %vm485_vm0, %v1383_v50  ;;  %v1163_v25 = vld [vmem:[%s1972_s3 + $0x98] sm:$0xff]  ;;  %v1160_v41 = vld [vmem:[%s1972_s3 + $0x80] sm:$0xff]  ;;  %v1186_v58 = vld [vmem:[%s1972_s3 + $0x150] sm:$0xff] }
 0x117   :  { %1239 = vmatpush.msrb.mxu1 %v1171_v47  ;;  %v1191_v32 = vld [vmem:[%s1972_s3 + $0x178] sm:$0xff] }
 0x118   :  { %1219 = vmatpush.msra.mxu3 %v1152_v46  ;;  %v673_v56 = vpop.f32.mrf.mxu3  ;;  %1258 = vmatpush.msrb.mxu2 %v1191_v32  ;;  %v1187_v49 = vld [vmem:[%s1972_s3 + $0x158] sm:$0xff] }
 0x119   :  { %1240 = vmatpush.msrb.mxu1 %v1170_v51  ;;  %v674_v12 = vadd.f32 %v673_v56, %v478_v43  ;;  %v1189_v43 = vld [vmem:[%s1972_s3 + $0x168] sm:$0xff]  ;;  %v1178_v56 = vld [vmem:[%s1972_s3 + $0x110] sm:$0xff]  ;;  %v1199_v32 = vld [vmem:[%s1972_s3 + $0x1b8] sm:$0xff] }
 0x11a   :  { %1220 = vmatpush.msra.mxu3 %v1151_v38  ;;  %v696_v10 = vpop.f32.mrf.mxu2  ;;  %1259 = vmatpush.msrb.mxu2 %v1190_v39 }
 0x11b   :  { %1241 = vmatpush.msrb.mxu1 %v1169_v55  ;;  %v697_v22 = vadd.f32 %v696_v10, %v674_v12  ;;  %v1183_v55 = vld [vmem:[%s1972_s3 + $0x138] sm:$0xff] }
 0x11c   :  { %1221 = vmatpush.msra.mxu3 %v1150_v54  ;;  %1109 = vmatmul.f32.gmra.mxu0 %v1384_v63  ;;  %v1184_v54 = vld [vmem:[%s1972_s3 + $0x140] sm:$0xff]  ;;  %v1177_v63 = vld [vmem:[%s1972_s3 + $0x108] sm:$0xff] }
 0x11d   :  { %1242 = vmatpush.msrb.mxu1 %v1168_v35  ;;  %v719_v7 = vpop.f32.mrf.mxu0  ;;  %1260 = vmatpush.msrb.mxu2 %v1189_v43  ;;  %v479_v35 = vperm.slane %v1657_v1, 2 }
 0x11e   :  { %1222 = vmatpush.msra.mxu3 %v1149_v62  ;;  %1364 = vmatmul.msk.f32.gmra.mxu1 %vm485_vm0, %v1385_v4  ;;  %v720_v30 = vadd.f32 %v719_v7, %v697_v22  ;;  %v1179_v62 = vld [vmem:[%s1972_s3 + $0x118] sm:$0xff]  ;;  %v1201_v22 = vld [vmem:[%s1972_s3 + $0x1c8] sm:$0xff] }
 0x11f   :  { %1243 = vmatpush.msrb.mxu1 %v1167_v9  ;;  %1261 = vmatpush.msrb.mxu2 %v1188_v44  ;;  %v1206_v9 = vld [vmem:[%s1972_s3 + $0x1f0] sm:$0xff] }
 0x120   :  { %1223 = vmatpush.msra.mxu3 %v1148_v48  ;;  %v739_v18 = vpop.f32.mrf.mxu1 }
 0x121   :  { %1244 = vmatpush.msrb.mxu1 %v1166_v24  ;;  %v740_v21 = vadd.f32 %v739_v18, %v717_v6  ;;  %v762_v3 = vpop.f32.mrf.mxu3  ;;  %1262 = vmatpush.msrb.mxu2 %v1187_v49  ;;  %v1203_v18 = vld [vmem:[%s1972_s3 + $0x1d8] sm:$0xff] }
 0x122   :  { %1224 = vmatpush.msra.mxu3 %v1147_v5  ;;  %v1207_v5 = vld [vmem:[%s1972_s3 + $0x1f8] sm:$0xff] }
 0x123   :  { %1245 = vmatpush.msrb.mxu1 %v1165_v20  ;;  %v763_v33 = vadd.f32 %v762_v3, %v740_v21  ;;  %1263 = vmatpush.msrb.mxu2 %v1186_v58 }
 0x124   :  { %1225 = vmatpush.msra.mxu3 %v1146_v11  ;;  %v785_v27 = vpop.f32.mrf.mxu2  ;;  %1281 = vmatpush.msra.mxu0 %v1207_v5  ;;  %v1205_v11 = vld [vmem:[%s1972_s3 + $0x1e8] sm:$0xff] }
 0x125   :  { %1246 = vmatpush.msrb.mxu1 %v1164_v61  ;;  %v786_v8 = vadd.f32 %v785_v27, %v763_v33  ;;  %1264 = vmatpush.msrb.mxu2 %v1185_v52  ;;  %v1202_v61 = vld [vmem:[%s1972_s3 + $0x1d0] sm:$0xff] }
 0x126   :  { %1226 = vmatpush.msra.mxu3 %v1145_v16  ;;  %1282 = vmatpush.msra.mxu0 %v1206_v9  ;;  %v1204_v16 = vld [vmem:[%s1972_s3 + $0x1e0] sm:$0xff] }
 0x127   :  { %1247 = vmatpush.msrb.mxu1 %v1163_v25  ;;  %v808_v31 = vpop.f32.mrf.mxu0  ;;  %1265 = vmatpush.msrb.mxu2 %v1184_v54 }
 0x128   :  { %1227 = vmatpush.msra.mxu3 %v1144_v17  ;;  %v809_v36 = vadd.f32 %v808_v31, %v786_v8  ;;  %1283 = vmatpush.msra.mxu0 %v1205_v11  ;;  %v1200_v8 = vld [vmem:[%s1972_s3 + $0x1c0] sm:$0xff] }
 0x129   :  { %1228 = vmatmul.f32.vlgmr.msra.gmra.mxu3 %v1136_v23  ;;  %1248 = vmatpush.msrb.mxu1 %v1162_v29 }
 0x12a   :  { %v1137_v28 = vmax.f32 %v809_v36, 0.0  ;;  %v742_v40 = vpop.f32.mrf.mxu1  ;;  %v765_v19 = vpop.f32.mrf.mxu3  ;;  %1266 = vmatpush.msrb.mxu2 %v1183_v55  ;;  %1284 = vmatpush.msra.mxu0 %v1204_v16  ;;  %v1198_v36 = vld [vmem:[%s1972_s3 + $0x1b0] sm:$0xff] }
 0x12b   :  { %v743_v42 = vadd.f32 %v742_v40, %v720_v30  ;;  %1249 = vmatpush.msrb.mxu1 %v1161_v37  ;;  %v1320_v16 = vld [vmem:[%s1974_s5 + $0x70] sm:$0xff] }
 0x12c   :  { %1267 = vmatpush.msrb.mxu2 %v1182_v57  ;;  %1285 = vmatpush.msra.mxu0 %v1203_v18  ;;  %v1319_v18 = vld [vmem:[%s1974_s5 + $0x68] sm:$0xff] }
 0x12d   :  { %v766_v46 = vadd.f32 %v765_v19, %v743_v42  ;;  %1250 = vmatpush.msrb.mxu1 %v1160_v41  ;;  %v788_v47 = vpop.f32.mrf.mxu2  ;;  %v1196_v41 = vld [vmem:[%s1972_s3 + $0x1a0] sm:$0xff]  ;;  %v1195_v19 = vld [vmem:[%s1972_s3 + $0x198] sm:$0xff] }
 0x12e   :  { %1251 = vmatmul.f32.vlgmr.msrb.gmra.mxu1 %v1137_v28  ;;  %1268 = vmatpush.msrb.mxu2 %v1181_v59  ;;  %v1197_v28 = vld [vmem:[%s1972_s3 + $0x1a8] sm:$0xff] }
 0x12f   :  { %v789_v50 = vadd.f32 %v788_v47, %v766_v46  ;;  %1286 = vmatpush.msra.mxu0 %v1202_v61  ;;  %v1193_v46 = vld [vmem:[%s1972_s3 + $0x188] sm:$0xff]  ;;  %v1192_v47 = vld [vmem:[%s1972_s3 + $0x180] sm:$0xff] }
 0x130   :  { %v811_v38 = vpop.f32.mrf.mxu0  ;;  %1269 = vmatpush.msrb.mxu2 %v1180_v60  ;;  %v1314_v61 = vld [vmem:[%s1974_s5 + $0x40] sm:$0xff] }
 0x131   :  { %1231 = vmatmul.f32.gmra.mxu3 %v1140_v45  ;;  %v812_v51 = vadd.f32 %v811_v38, %v789_v50  ;;  %1287 = vmatpush.msra.mxu0 %v1201_v22  ;;  %v1194_v45 = vld [vmem:[%s1972_s3 + $0x190] sm:$0xff]  ;;  %v480_v50 = vperm.slane %v1657_v1, 3  ;;  %v1313_v22 = vld [vmem:[%s1974_s5 + $0x38] sm:$0xff] }
 0x132   :  { %1270 = vmatpush.msrb.mxu2 %v1179_v62 }
 0x133   :  { %v1141_v53 = vmax.f32 %v812_v51, 0.0  ;;  %1288 = vmatpush.msra.mxu0 %v1200_v8  ;;  %v1307_v8 = vld [vmem:[%s1974_s5 + $0x8] sm:$0xff] }
 0x134   :  { %1271 = vmatpush.msrb.mxu2 %v1178_v56 }
 0x135   :  { %1289 = vmatpush.msra.mxu0 %v1199_v32 }
 0x136   :  { %1254 = vmatmul.f32.gmra.mxu1 %v1141_v53  ;;  %1272 = vmatpush.msrb.mxu2 %v1177_v63 }
 0x137   :  { %1290 = vmatpush.msra.mxu0 %v1198_v36 }
 0x138   :  { %1273 = vmatpush.msrb.mxu2 %v1176_v0 }
 0x139   :  { %1291 = vmatpush.msra.mxu0 %v1197_v28 }
 0x13b   :  { %1292 = vmatpush.msra.mxu0 %v1196_v41 }
 0x13d   :  { %1293 = vmatpush.msra.mxu0 %v1195_v19 }
 0x13f   :  { %1294 = vmatpush.msra.mxu0 %v1194_v45 }
 0x141   :  { %v831_v48 = vpop.f32.mrf.mxu1  ;;  %1295 = vmatpush.msra.mxu0 %v1193_v46 }
 0x142   :  { %v832_v15 = vadd.f32 %v831_v48, %v479_v35 }
 0x143   :  { %1296 = vmatpush.msra.mxu0 %v1192_v47 }
 0x145   :  { %v854_v10 = vpop.f32.mrf.mxu3  ;;  %v877_v2 = vpop.f32.mrf.mxu0 }
 0x146   :  { %v855_v6 = vadd.f32 %v854_v10, %v832_v15 }
 0x148   :  { %v878_v24 = vadd.f32 %v877_v2, %v855_v6 }
 0x149   :  { %v900_v13 = vpop.f32.mrf.mxu2 }
 0x14a   :  { %v901_v21 = vadd.f32 %v900_v13, %v878_v24 }
 0x14d   :  { %v857_v7 = vpop.f32.mrf.mxu3 }
 0x154   :  { %v834_v4 = vpop.f32.mrf.mxu1 }
 0x155   :  { %v835_v12 = vadd.f32 %v834_v4, %v479_v35 }
 0x157   :  { %v858_v3 = vadd.f32 %v857_v7, %v835_v12 }
 0x158   :  { %v880_v14 = vpop.f32.mrf.mxu0 }
 0x159   :  { %v881_v23 = vadd.f32 %v880_v14, %v858_v3  ;;  %v1321_v14 = vld [vmem:[%s1974_s5 + $0x78] sm:$0xff]  ;;  %v1316_v3 = vld [vmem:[%s1974_s5 + $0x50] sm:$0xff] }
 0x15a   :  { %1326 = vmatpush.msrb.mxu3 %v1321_v14 }
 0x15c   :  { %v923_v20 = vpop.f32.mrf.mxu1  ;;  %1327 = vmatpush.msrb.mxu3 %v1320_v16 }
 0x15d   :  { %v924_v17 = vadd.f32 %v923_v20, %v901_v21  ;;  %v1318_v20 = vld [vmem:[%s1974_s5 + $0x60] sm:$0xff]  ;;  %v1317_v21 = vld [vmem:[%s1974_s5 + $0x58] sm:$0xff] }
 0x15e   :  { %1328 = vmatpush.msrb.mxu3 %v1319_v18 }
 0x160   :  { %1329 = vmatpush.msrb.mxu3 %v1318_v20 }
 0x162   :  { %1330 = vmatpush.msrb.mxu3 %v1317_v21 }
 0x163   :  { %v946_v33 = vpop.f32.mrf.mxu3 }
 0x164   :  { %v947_v26 = vadd.f32 %v946_v33, %v924_v17  ;;  %v1315_v17 = vld [vmem:[%s1974_s5 + $0x48] sm:$0xff]  ;;  %1331 = vmatpush.msrb.mxu3 %v1316_v3  ;;  %v1312_v33 = vld [vmem:[%s1974_s5 + $0x30] sm:$0xff] }
 0x165   :  { %v903_v27 = vpop.f32.mrf.mxu2  ;;  %v969_v25 = vpop.f32.mrf.mxu0 }
 0x166   :  { %v904_v29 = vadd.f32 %v903_v27, %v881_v23  ;;  %v970_v30 = vadd.f32 %v969_v25, %v947_v26  ;;  %1332 = vmatpush.msrb.mxu3 %v1315_v17  ;;  %v1311_v23 = vld [vmem:[%s1974_s5 + $0x28] sm:$0xff]  ;;  %v1310_v26 = vld [vmem:[%s1974_s5 + $0x20] sm:$0xff]  ;;  %v1309_v27 = vld [vmem:[%s1974_s5 + $0x18] sm:$0xff] }
 0x167   :  { %v1308_v25 = vld [vmem:[%s1974_s5 + $0x10] sm:$0xff] }
 0x168   :  { %v926_v31 = vpop.f32.mrf.mxu1  ;;  %v1138_v34 = vmax.f32 %v970_v30, 0.0  ;;  %1333 = vmatpush.msrb.mxu3 %v1314_v61 }
 0x169   :  { %v927_v37 = vadd.f32 %v926_v31, %v904_v29  ;;  %v1306_v29 = vld [vmem:[%s1974_s5] sm:$0xff] }
 0x16a   :  { %1274 = vmatmul.f32.vlgmr.msrb.gmra.mxu2 %v1138_v34  ;;  %1334 = vmatpush.msrb.mxu3 %v1313_v22  ;;  %v1370_v31 = vld [vmem:[#allocation6] ss:$0 sm:$0xff] }
 0x16c   :  { %v949_v39 = vpop.f32.mrf.mxu3  ;;  %1335 = vmatpush.msrb.mxu3 %v1312_v33 }
 0x16d   :  { %v950_v40 = vadd.f32 %v949_v39, %v927_v37 }
 0x16e   :  { %1336 = vmatpush.msrb.mxu3 %v1311_v23 }
 0x170   :  { %v972_v42 = vpop.f32.mrf.mxu0  ;;  %1337 = vmatpush.msrb.mxu3 %v1310_v26 }
 0x171   :  { %v973_v43 = vadd.f32 %v972_v42, %v950_v40 }
 0x172   :  { %1338 = vmatpush.msrb.mxu3 %v1309_v27 }
 0x173   :  { %v1142_v44 = vmax.f32 %v973_v43, 0.0 }
 0x174   :  { %1339 = vmatpush.msrb.mxu3 %v1308_v25 }
 0x175   :  { %1277 = vmatmul.f32.gmra.mxu2 %v1142_v44 }
 0x176   :  { %1340 = vmatpush.msrb.mxu3 %v1307_v8 }
 0x178   :  { %v992_v49 = vpop.f32.mrf.mxu2  ;;  %1341 = vmatpush.msrb.mxu3 %v1306_v29 }
 0x179   :  { %v993_v51 = vadd.f32 %v992_v49, %v480_v50 }
 0x17b   :  { %v1015_v38 = vpop.f32.mrf.mxu0 }
 0x17c   :  { %v1016_v52 = vadd.f32 %v1015_v38, %v993_v51  ;;  %v1371_v38 = vld [vmem:[%s1975_s6] ss:$0 sm:$0xff] }
 0x181   :  { %v1038_v53 = vpop.f32.mrf.mxu1  ;;  %v995_v58 = vpop.f32.mrf.mxu2 }
 0x182   :  { %v1039_v55 = vadd.f32 %v1038_v53, %v1016_v52  ;;  %v996_v57 = vadd.f32 %v995_v58, %v480_v50 }
 0x183   :  { %v1018_v54 = vpop.f32.mrf.mxu0 }
 0x184   :  { %v1019_v63 = vadd.f32 %v1018_v54, %v996_v57 }
 0x18a   :  { %v1041_v62 = vpop.f32.mrf.mxu1 }
 0x18b   :  { %v1042_v35 = vadd.f32 %v1041_v62, %v1019_v63 }
 0x18c   :  { %v1061_v59 = vpop.f32.mrf.mxu3  ;;  %v1084_v56 = vpop.f32.mrf.mxu2 }
 0x18d   :  { %v1062_v60 = vadd.f32 %v1061_v59, %v1039_v55 }
 0x18f   :  { %v1085_v0 = vadd.f32 %v1084_v56, %v1062_v60 }
 0x191   :  { %v1107_v48 = vpop.f32.mrf.mxu0 }
 0x192   :  { %v1108_v10 = vadd.f32 %v1107_v48, %v1085_v0 }
 0x193   :  { %v1130_v2 = vpop.f32.mrf.mxu1 }
 0x194   :  { %v1064_v15 = vpop.f32.mrf.mxu3  ;;  %v1131_v4 = vadd.f32 %v1130_v2, %v1108_v10 }
 0x195   :  { %v1065_v1 = vadd.f32 %v1064_v15, %v1042_v35 }
 0x196   :  { %v1087_v5 = vpop.f32.mrf.mxu2  ;;  %v1139_v9 = vmax.f32 %v1131_v4, 0.0 }
 0x197   :  { %v1088_v6 = vadd.f32 %v1087_v5, %v1065_v1 }
 0x198   :  { %1297 = vmatmul.f32.vlgmr.msra.gmra.mxu0 %v1139_v9 }
 0x199   :  { %v1110_v7 = vpop.f32.mrf.mxu0 }
 0x19a   :  { %v1111_v11 = vadd.f32 %v1110_v7, %v1088_v6 }
 0x19b   :  { %v1133_v24 = vpop.f32.mrf.mxu1 }
 0x19c   :  { %v1134_v12 = vadd.f32 %v1133_v24, %v1111_v11 }
 0x19e   :  { %v1143_v13 = vmax.f32 %v1134_v12, 0.0 }
 0x1a0   :  { %1300 = vmatmul.f32.gmra.mxu0 %v1143_v13 }
 0x1ab   :  { %v1252_v32 = vpop.f32.mrf.mxu1 }
 0x1ac   :  { %v1229_v30 = vpop.f32.mrf.mxu3 }
 0x1ad   :  { %v1230_v36 = vadd.f32 %v1370_v31, %v1229_v30 }
 0x1af   :  { %v1253_v37 = vadd.f32 %v1252_v32, %v1230_v36 }
 0x1b3   :  { %v1255_v42 = vpop.f32.mrf.mxu1 }
 0x1b4   :  { %v1232_v28 = vpop.f32.mrf.mxu3 }
 0x1b5   :  { %v1233_v19 = vadd.f32 %v1370_v31, %v1232_v28 }
 0x1b7   :  { %v1256_v44 = vadd.f32 %v1255_v42, %v1233_v19 }
 0x1ed   :  { %v1275_v34 = vpop.f32.mrf.mxu2 }
 0x1ee   :  { %v1276_v39 = vadd.f32 %v1275_v34, %v1253_v37 }
 0x1f8   :  { %v1278_v45 = vpop.f32.mrf.mxu2 }
 0x1f9   :  { %v1279_v46 = vadd.f32 %v1278_v45, %v1256_v44 }
 0x215   :  { %v1298_v40 = vpop.f32.mrf.mxu0 }
 0x216   :  { %v1299_v41 = vadd.f32 %v1298_v40, %v1276_v39 }
 0x218   :  { %v1304_v43 = vmax.f32 %v1299_v41, 0.0 }
 0x21a   :  { %1342 = vmatmul.f32.vlgmr.msrb.gmra.mxu3 %v1304_v43 }
 0x21d   :  { %v1301_v47 = vpop.f32.mrf.mxu0 }
 0x21e   :  { %v1302_v49 = vadd.f32 %v1301_v47, %v1279_v46 }
 0x220   :  { %v1305_v50 = vmax.f32 %v1302_v49, 0.0 }
 0x222   :  { %1345 = vmatmul.f32.gmra.mxu3 %v1305_v50 }
 0x29d   :  { %v1343_v51 = vpop.f32.mrf.mxu3 }
 0x29e   :  { %v1344_v53 = vadd.f32 %v1371_v38, %v1343_v51 }
 0x2a0   :  { %1349 = vst [vmem:[%s1976_s7] sm:$0xff] %v1344_v53 }
 0x2a5   :  { %v1346_v58 = vpop.f32.mrf.mxu3 }
 0x2a6   :  { %v1347_v52 = vadd.f32 %v1371_v38, %v1346_v58 }
 0x2a8   :  { %1350 = vst [vmem:[%s1976_s7 + $0x8] sm:$0xff] %v1347_v52 }
 0x2a9   :  { %1355 = vsyncpa [#allocation3], 1 }
 0x2aa   :  { %1356 = vsyncpa [#allocation5], 1 }

</bundles_post_ra>
